<compile_context>
chip_gen: v5e
topology: v5e:2x2
jax: 0.10.0
libtpu: 0.0.40
codegen_flags: <defaults>
</compile_context>

<pallas_src>
import jax
import jax.numpy as jnp
from jax import lax
from jax.experimental import pallas as pl
from jax.experimental.pallas import tpu as pltpu

EPS = 1e-3  # BatchNorm eps (EfficientNet uses eps=1e-3)


def _sigmoid(x):
    # exp rides the EUP; approximate reciprocal also rides the EUP -> no VALU divides
    return pl.reciprocal(1.0 + jnp.exp(-x), approx=True)


def _fold_bn(gamma, beta, mean, var):
    scale = gamma / jnp.sqrt(var + EPS)
    return scale, beta - mean * scale


# ------------------------------- fused forward ------------------------------ #

def mbconv_forward(x_nchw, p):
    """Fused MBConv forward. x_nchw: (N, Cin, H, W) float32 in PyTorch NCHW layout."""
    N, Cin, H, W = x_nchw.shape
    HW = H * W
    Cexp = p['w_expand'].shape[1]
    Csq = p['w_se1'].shape[0]
    Cout = p['w_proj'].shape[1]
    assert Cin == Cout, "this config uses the residual connection (stride=1, Cin==Cout)"

    # ---- fold inference BatchNorm scales into the conv weights (tiny, wrapper-side) ----
    sc1, bi1 = _fold_bn(*p['bn1'])
    sc2, bi2 = _fold_bn(*p['bn2'])
    sc3, bi3 = _fold_bn(*p['bn3'])

    we_t = (p['w_expand'] * sc1[None, :]).T.astype(jnp.float32)       # (Cexp, Cin)
    b1 = bi1.reshape(Cexp, 1).astype(jnp.float32)
    wdw = (p['w_dw'] * sc2).reshape(9, Cexp).T.astype(jnp.float32)    # (Cexp, 9)  [c, kh*3+kw]
    b2 = bi2.reshape(Cexp, 1).astype(jnp.float32)
    wse1_t = p['w_se1'].T.astype(jnp.float32)                         # (Cexp, Csq)
    bse1 = p['b_se1'].reshape(1, Csq).astype(jnp.float32)
    wse2 = p['w_se2'].astype(jnp.float32)                             # (Cexp, Csq)
    bse2 = p['b_se2'].reshape(Cexp, 1).astype(jnp.float32)
    wp_t = (p['w_proj'] * sc3[None, :]).T.astype(jnp.float32)         # (Cout, Cexp)
    b3 = bi3.reshape(Cout, 1).astype(jnp.float32)

    # Boundary-validity masks for the 9 depthwise taps on the flattened H*W axis.
    # Tap (kh,kw) reads pixel (h+kh-1, w+kw-1); the mask zeroes off-image contributions
    # (which is exactly where the circular lane-roll would otherwise wrap).
    hh = jnp.arange(H)[:, None]
    ww = jnp.arange(W)[None, :]
    mask_rows = []
    for kh in range(3):
        for kw in range(3):
            dh, dw = kh - 1, kw - 1
            valid = ((hh + dh >= 0) & (hh + dh < H) &
                     (ww + dw >= 0) & (ww + dw < W))
            mask_rows.append(valid.reshape(HW))
    masks = jnp.stack(mask_rows, axis=0).astype(jnp.float32)          # (9, HW)

    x3 = x_nchw.reshape(N, Cin, HW).astype(jnp.float32)               # NCHW, lane-dense minor

    def kernel(x_ref, we_ref, b1_ref, wdw_ref, b2_ref, m_ref,
               wse1_ref, bse1_ref, wse2_ref, bse2_ref, wp_ref, b3_ref, o_ref):
        x = x_ref[0]                                                  # (Cin, HW)

        # --- 1x1 expand conv (BN1 folded) + SiLU : MXU ---
        e = jnp.dot(we_ref[...], x, preferred_element_type=jnp.float32)   # (Cexp, HW)
        e = e + b1_ref[...]
        e = e * _sigmoid(e)

        # --- 3x3 depthwise conv (BN2 folded): lane rolls on flattened HW + masks ---
        w9 = wdw_ref[...]                                             # (Cexp, 9)
        m9 = m_ref[...]                                               # (9, HW)
        acc = e * w9[:, 4:5]                                          # centre tap (kh=1, kw=1)
        for kh in range(3):
            for kw in range(3):
                if kh == 1 and kw == 1:
                    continue
                tap = kh * 3 + kw
                s = (kh - 1) * W + (kw - 1)                           # flattened-HW offset of tap
                t = pltpu.roll(e, (-s) % HW, axis=1)                  # t[:, p] = e[:, (p + s) % HW]
                acc = acc + (t * m9[tap:tap + 1, :]) * w9[:, tap:tap + 1]
        y = acc + b2_ref[...]
        d = y * _sigmoid(y)                                           # (Cexp, HW)

        # --- Squeeze-Excitation (tiny FCs as VPU/XLU reductions, no transposes) ---
        pooled = jnp.mean(d, axis=1, keepdims=True)                   # (Cexp, 1)
        s1 = jnp.sum(wse1_ref[...] * pooled, axis=0, keepdims=True) + bse1_ref[...]  # (1, Csq)
        s1 = s1 * _sigmoid(s1)
        s2 = jnp.sum(wse2_ref[...] * s1, axis=1, keepdims=True) + bse2_ref[...]      # (Cexp, 1)
        d = d * _sigmoid(s2)

        # --- 1x1 project conv (BN3 folded) + residual : MXU ---
        o = jnp.dot(wp_ref[...], d, preferred_element_type=jnp.float32)  # (Cout, HW)
        o_ref[0] = o + b3_ref[...] + x

    # Advisory cost estimate so XLA's scheduler places the custom call sensibly.
    flops = N * 2 * HW * (Cexp * Cin + 9 * Cexp + Cout * Cexp)
    transcendentals = N * (2 * Cexp * HW + 2 * Cexp + Csq)            # exp count (SiLU/sigmoid)
    bytes_accessed = 4 * (2 * N * Cin * HW                            # x in + out
                          + Cexp * Cin + Cexp * 9 + 9 * HW
                          + 2 * Cexp * Csq + Cout * Cexp
                          + 3 * Cexp + Csq + Cout)

    out = pl.pallas_call(
        kernel,
        out_shape=jax.ShapeDtypeStruct((N, Cout, HW), jnp.float32),
        grid=(N,),
        in_specs=[
            pl.BlockSpec((1, Cin, HW), lambda n: (n, 0, 0)),   # x (per-image block, NCHW)
            pl.BlockSpec((Cexp, Cin), lambda n: (0, 0)),       # expand weight (BN folded, T)
            pl.BlockSpec((Cexp, 1), lambda n: (0, 0)),         # expand bias
            pl.BlockSpec((Cexp, 9), lambda n: (0, 0)),         # depthwise weight (BN folded)
            pl.BlockSpec((Cexp, 1), lambda n: (0, 0)),         # depthwise bias
            pl.BlockSpec((9, HW), lambda n: (0, 0)),           # tap boundary masks
            pl.BlockSpec((Cexp, Csq), lambda n: (0, 0)),       # SE fc1 weight (T)
            pl.BlockSpec((1, Csq), lambda n: (0, 0)),          # SE fc1 bias
            pl.BlockSpec((Cexp, Csq), lambda n: (0, 0)),       # SE fc2 weight
            pl.BlockSpec((Cexp, 1), lambda n: (0, 0)),         # SE fc2 bias
            pl.BlockSpec((Cout, Cexp), lambda n: (0, 0)),      # project weight (BN folded, T)
            pl.BlockSpec((Cout, 1), lambda n: (0, 0)),         # project bias
        ],
        out_specs=pl.BlockSpec((1, Cout, HW), lambda n: (n, 0, 0)),
        compiler_params=pltpu.CompilerParams(dimension_semantics=("parallel",)),
        cost_estimate=pl.CostEstimate(flops=flops, transcendentals=transcendentals,
                                      bytes_accessed=bytes_accessed),
    )(x3, we_t, b1, wdw, b2, masks, wse1_t, bse1, wse2, bse2, wp_t, b3)

    return out.reshape(N, Cout, H, W)   # already NCHW -> free reshape, no transpose


# ------------------------- parameters & reference --------------------------- #

def init_params(key, cin, cexp, csq, cout):
    ks = jax.random.split(key, 10)

    def bn(k, c):
        k1, k2, k3, k4 = jax.random.split(k, 4)
        gamma = jax.random.uniform(k1, (c,), jnp.float32, 0.5, 1.5)
        beta = 0.1 * jax.random.normal(k2, (c,), jnp.float32)
        mean = 0.1 * jax.random.normal(k3, (c,), jnp.float32)
        var = jax.random.uniform(k4, (c,), jnp.float32, 0.5, 1.5)
        return (gamma, beta, mean, var)

    return {
        'w_expand': 0.2 * jax.random.normal(ks[0], (cin, cexp), jnp.float32),
        'bn1': bn(ks[1], cexp),
        'w_dw': 0.2 * jax.random.normal(ks[2], (3, 3, cexp), jnp.float32),
        'bn2': bn(ks[3], cexp),
        'w_se1': 0.2 * jax.random.normal(ks[4], (csq, cexp), jnp.float32),
        'b_se1': 0.1 * jax.random.normal(ks[5], (csq,), jnp.float32),
        'w_se2': 0.2 * jax.random.normal(ks[6], (cexp, csq), jnp.float32),
        'b_se2': 0.1 * jax.random.normal(ks[7], (cexp,), jnp.float32),
        'w_proj': 0.2 * jax.random.normal(ks[8], (cexp, cout), jnp.float32),
        'bn3': bn(ks[9], cout),
    }


def ref_forward(x_nchw, p):
    """Pure-JAX reference mirroring the PyTorch MBConv (eval mode)."""
    x = jnp.transpose(x_nchw, (0, 2, 3, 1))
    N, H, W, Cin = x.shape
    Cexp = p['w_expand'].shape[1]
    dn = ('NHWC', 'HWIO', 'NHWC')
    hp = lax.Precision.HIGHEST

    def bn(y, prm):
        gamma, beta, mean, var = prm
        return (y - mean) / jnp.sqrt(var + EPS) * gamma + beta

    silu = jax.nn.silu
    e = lax.conv_general_dilated(x, p['w_expand'].reshape(1, 1, Cin, Cexp),
                                 (1, 1), 'VALID', dimension_numbers=dn, precision=hp)
    e = silu(bn(e, p['bn1']))
    d = lax.conv_general_dilated(e, p['w_dw'].reshape(3, 3, 1, Cexp),
                                 (1, 1), 'SAME', dimension_numbers=dn,
                                 feature_group_count=Cexp, precision=hp)
    d = silu(bn(d, p['bn2']))
    pooled = jnp.mean(d, axis=(1, 2))
    s1 = silu(pooled @ p['w_se1'].T + p['b_se1'])
    s2 = jax.nn.sigmoid(s1 @ p['w_se2'].T + p['b_se2'])
    d = d * s2[:, None, None, :]
    o = lax.conv_general_dilated(d, p['w_proj'].reshape(1, 1, Cexp, -1),
                                 (1, 1), 'VALID', dimension_numbers=dn, precision=hp)
    o = bn(o, p['bn3'])
    o = o + x
    return jnp.transpose(o, (0, 3, 1, 2))


if __name__ == "__main__":
    # Equivalent to MBConvConfig(expand_ratio=4, kernel=3, stride=1,
    #                            input_channels=8, out_channels=8,
    #                            num_layers=1, width_mult=1.0, depth_mult=1.0)
    N, Cin, H, W = 2, 8, 16, 16
    Cexp = 4 * Cin               # adjust_channels(8 * 4, 1.0) = 32
    Csq = max(1, Cin // 4)       # 2
    Cout = Cin                   # stride=1, Cin==Cout -> use_res_connect

    key = jax.random.PRNGKey(0)
    kx, kp = jax.random.split(key)
    x = jax.random.normal(kx, (N, Cin, H, W), jnp.float32)
    params = init_params(kp, Cin, Cexp, Csq, Cout)

    out = jax.block_until_ready(mbconv_forward(x, params))
    ref = jax.block_until_ready(ref_forward(x, params))

    assert out.shape == (N, Cout, H, W)
    max_err = float(jnp.max(jnp.abs(out - ref)))
    assert jnp.allclose(out, ref, rtol=2e-2, atol=2e-2), f"max abs err {max_err}"
    print("KERNEL_OK")
</pallas_src>

<mosaic_0001>
module attributes {stable_mosaic.version = 11 : i64} {
  func.func @kernel(%arg0: i32, %arg1: memref<1x8x256xf32, #tpu.memory_space<vmem>>, %arg2: memref<32x8xf32, #tpu.memory_space<vmem>>, %arg3: memref<32x1xf32, #tpu.memory_space<vmem>>, %arg4: memref<32x9xf32, #tpu.memory_space<vmem>>, %arg5: memref<32x1xf32, #tpu.memory_space<vmem>>, %arg6: memref<9x256xf32, #tpu.memory_space<vmem>>, %arg7: memref<32x2xf32, #tpu.memory_space<vmem>>, %arg8: memref<1x2xf32, #tpu.memory_space<vmem>>, %arg9: memref<32x2xf32, #tpu.memory_space<vmem>>, %arg10: memref<32x1xf32, #tpu.memory_space<vmem>>, %arg11: memref<8x32xf32, #tpu.memory_space<vmem>>, %arg12: memref<8x1xf32, #tpu.memory_space<vmem>>, %arg13: memref<1x8x256xf32, #tpu.memory_space<vmem>>) attributes {dimension_semantics = [#tpu.dimension_semantics<parallel>], iteration_bounds = array<i64: 2>, scalar_prefetch = 0 : i64, scratch_operands = 0 : i64, tpu.core_type = #tpu.core_type<tc>, window_params = [{transform_indices = @transform_0, window_bounds = array<i64: 1, 8, 256>}, {pipeline_mode = #tpu.pipeline_mode<synchronous>, transform_indices = @transform_1, window_bounds = array<i64: 32, 8>}, {pipeline_mode = #tpu.pipeline_mode<synchronous>, transform_indices = @transform_2, window_bounds = array<i64: 32, 1>}, {pipeline_mode = #tpu.pipeline_mode<synchronous>, transform_indices = @transform_3, window_bounds = array<i64: 32, 9>}, {pipeline_mode = #tpu.pipeline_mode<synchronous>, transform_indices = @transform_4, window_bounds = array<i64: 32, 1>}, {pipeline_mode = #tpu.pipeline_mode<synchronous>, transform_indices = @transform_5, window_bounds = array<i64: 9, 256>}, {pipeline_mode = #tpu.pipeline_mode<synchronous>, transform_indices = @transform_6, window_bounds = array<i64: 32, 2>}, {pipeline_mode = #tpu.pipeline_mode<synchronous>, transform_indices = @transform_7, window_bounds = array<i64: 1, 2>}, {pipeline_mode = #tpu.pipeline_mode<synchronous>, transform_indices = @transform_8, window_bounds = array<i64: 32, 2>}, {pipeline_mode = #tpu.pipeline_mode<synchronous>, transform_indices = @transform_9, window_bounds = array<i64: 32, 1>}, {pipeline_mode = #tpu.pipeline_mode<synchronous>, transform_indices = @transform_10, window_bounds = array<i64: 8, 32>}, {pipeline_mode = #tpu.pipeline_mode<synchronous>, transform_indices = @transform_11, window_bounds = array<i64: 8, 1>}, {transform_indices = @transform_12, window_bounds = array<i64: 1, 8, 256>}]} {
    %c0 = arith.constant 0 : index
    %c0_0 = arith.constant 0 : index
    %c0_1 = arith.constant 0 : index
    %0 = vector.load %arg1[%c0, %c0_0, %c0_1] : memref<1x8x256xf32, #tpu.memory_space<vmem>>, vector<1x8x256xf32>
    %1 = vector.shape_cast %0 : vector<1x8x256xf32> to vector<8x256xf32>
    %c0_2 = arith.constant 0 : index
    %c0_3 = arith.constant 0 : index
    %2 = vector.load %arg2[%c0_2, %c0_3] : memref<32x8xf32, #tpu.memory_space<vmem>>, vector<32x8xf32>
    %cst = arith.constant dense<0.000000e+00> : vector<32x256xf32>
    %3 = tpu.matmul %2, %1, %cst {dimension_numbers = #tpu.dot_dimension_numbers<[1], [0], [0], [1], [0, 0, 1, 1], [], []>} : vector<32x8xf32>, vector<8x256xf32>, vector<32x256xf32> -> vector<32x256xf32>
    %c0_4 = arith.constant 0 : index
    %c0_5 = arith.constant 0 : index
    %4 = vector.load %arg3[%c0_4, %c0_5] : memref<32x1xf32, #tpu.memory_space<vmem>>, vector<32x1xf32>
    %5 = vector.broadcast %4 : vector<32x1xf32> to vector<32x256xf32>
    %6 = arith.addf %3, %5 : vector<32x256xf32>
    %cst_6 = arith.constant 0.000000e+00 : f32
    %7 = vector.broadcast %cst_6 : f32 to vector<32x256xf32>
    %8 = arith.subf %7, %6 : vector<32x256xf32>
    %9 = math.exp %8 : vector<32x256xf32>
    %cst_7 = arith.constant 1.000000e+00 : f32
    %10 = vector.broadcast %cst_7 : f32 to vector<32x256xf32>
    %11 = arith.addf %10, %9 : vector<32x256xf32>
    %12 = tpu.reciprocal %11 {approx = true} : vector<32x256xf32> -> vector<32x256xf32>
    %13 = arith.mulf %6, %12 : vector<32x256xf32>
    %c0_8 = arith.constant 0 : index
    %c0_9 = arith.constant 0 : index
    %14 = vector.load %arg4[%c0_8, %c0_9] : memref<32x9xf32, #tpu.memory_space<vmem>>, vector<32x9xf32>
    %c0_10 = arith.constant 0 : index
    %c0_11 = arith.constant 0 : index
    %15 = vector.load %arg6[%c0_10, %c0_11] : memref<9x256xf32, #tpu.memory_space<vmem>>, vector<9x256xf32>
    %16 = vector.extract_strided_slice %14 {offsets = [0, 4], sizes = [32, 1], strides = [1, 1]} : vector<32x9xf32> to vector<32x1xf32>
    %17 = vector.broadcast %16 : vector<32x1xf32> to vector<32x256xf32>
    %18 = arith.mulf %13, %17 : vector<32x256xf32>
    %c17_i32 = arith.constant 17 : i32
    %19 = tpu.dynamic_rotate %13 by %c17_i32 dim 1 : vector<32x256xf32>, i32 -> vector<32x256xf32>
    %20 = vector.extract_strided_slice %15 {offsets = [0, 0], sizes = [1, 256], strides = [1, 1]} : vector<9x256xf32> to vector<1x256xf32>
    %21 = vector.broadcast %20 : vector<1x256xf32> to vector<32x256xf32>
    %22 = arith.mulf %19, %21 : vector<32x256xf32>
    %23 = vector.extract_strided_slice %14 {offsets = [0, 0], sizes = [32, 1], strides = [1, 1]} : vector<32x9xf32> to vector<32x1xf32>
    %24 = vector.broadcast %23 : vector<32x1xf32> to vector<32x256xf32>
    %25 = arith.mulf %22, %24 : vector<32x256xf32>
    %26 = arith.addf %18, %25 : vector<32x256xf32>
    %c16_i32 = arith.constant 16 : i32
    %27 = tpu.dynamic_rotate %13 by %c16_i32 dim 1 : vector<32x256xf32>, i32 -> vector<32x256xf32>
    %28 = vector.extract_strided_slice %15 {offsets = [1, 0], sizes = [1, 256], strides = [1, 1]} : vector<9x256xf32> to vector<1x256xf32>
    %29 = vector.broadcast %28 : vector<1x256xf32> to vector<32x256xf32>
    %30 = arith.mulf %27, %29 : vector<32x256xf32>
    %31 = vector.extract_strided_slice %14 {offsets = [0, 1], sizes = [32, 1], strides = [1, 1]} : vector<32x9xf32> to vector<32x1xf32>
    %32 = vector.broadcast %31 : vector<32x1xf32> to vector<32x256xf32>
    %33 = arith.mulf %30, %32 : vector<32x256xf32>
    %34 = arith.addf %26, %33 : vector<32x256xf32>
    %c15_i32 = arith.constant 15 : i32
    %35 = tpu.dynamic_rotate %13 by %c15_i32 dim 1 : vector<32x256xf32>, i32 -> vector<32x256xf32>
    %36 = vector.extract_strided_slice %15 {offsets = [2, 0], sizes = [1, 256], strides = [1, 1]} : vector<9x256xf32> to vector<1x256xf32>
    %37 = vector.broadcast %36 : vector<1x256xf32> to vector<32x256xf32>
    %38 = arith.mulf %35, %37 : vector<32x256xf32>
    %39 = vector.extract_strided_slice %14 {offsets = [0, 2], sizes = [32, 1], strides = [1, 1]} : vector<32x9xf32> to vector<32x1xf32>
    %40 = vector.broadcast %39 : vector<32x1xf32> to vector<32x256xf32>
    %41 = arith.mulf %38, %40 : vector<32x256xf32>
    %42 = arith.addf %34, %41 : vector<32x256xf32>
    %c1_i32 = arith.constant 1 : i32
    %43 = tpu.dynamic_rotate %13 by %c1_i32 dim 1 : vector<32x256xf32>, i32 -> vector<32x256xf32>
    %44 = vector.extract_strided_slice %15 {offsets = [3, 0], sizes = [1, 256], strides = [1, 1]} : vector<9x256xf32> to vector<1x256xf32>
    %45 = vector.broadcast %44 : vector<1x256xf32> to vector<32x256xf32>
    %46 = arith.mulf %43, %45 : vector<32x256xf32>
    %47 = vector.extract_strided_slice %14 {offsets = [0, 3], sizes = [32, 1], strides = [1, 1]} : vector<32x9xf32> to vector<32x1xf32>
    %48 = vector.broadcast %47 : vector<32x1xf32> to vector<32x256xf32>
    %49 = arith.mulf %46, %48 : vector<32x256xf32>
    %50 = arith.addf %42, %49 : vector<32x256xf32>
    %c255_i32 = arith.constant 255 : i32
    %51 = tpu.dynamic_rotate %13 by %c255_i32 dim 1 : vector<32x256xf32>, i32 -> vector<32x256xf32>
    %52 = vector.extract_strided_slice %15 {offsets = [5, 0], sizes = [1, 256], strides = [1, 1]} : vector<9x256xf32> to vector<1x256xf32>
    %53 = vector.broadcast %52 : vector<1x256xf32> to vector<32x256xf32>
    %54 = arith.mulf %51, %53 : vector<32x256xf32>
    %55 = vector.extract_strided_slice %14 {offsets = [0, 5], sizes = [32, 1], strides = [1, 1]} : vector<32x9xf32> to vector<32x1xf32>
    %56 = vector.broadcast %55 : vector<32x1xf32> to vector<32x256xf32>
    %57 = arith.mulf %54, %56 : vector<32x256xf32>
    %58 = arith.addf %50, %57 : vector<32x256xf32>
    %c241_i32 = arith.constant 241 : i32
    %59 = tpu.dynamic_rotate %13 by %c241_i32 dim 1 : vector<32x256xf32>, i32 -> vector<32x256xf32>
    %60 = vector.extract_strided_slice %15 {offsets = [6, 0], sizes = [1, 256], strides = [1, 1]} : vector<9x256xf32> to vector<1x256xf32>
    %61 = vector.broadcast %60 : vector<1x256xf32> to vector<32x256xf32>
    %62 = arith.mulf %59, %61 : vector<32x256xf32>
    %63 = vector.extract_strided_slice %14 {offsets = [0, 6], sizes = [32, 1], strides = [1, 1]} : vector<32x9xf32> to vector<32x1xf32>
    %64 = vector.broadcast %63 : vector<32x1xf32> to vector<32x256xf32>
    %65 = arith.mulf %62, %64 : vector<32x256xf32>
    %66 = arith.addf %58, %65 : vector<32x256xf32>
    %c240_i32 = arith.constant 240 : i32
    %67 = tpu.dynamic_rotate %13 by %c240_i32 dim 1 : vector<32x256xf32>, i32 -> vector<32x256xf32>
    %68 = vector.extract_strided_slice %15 {offsets = [7, 0], sizes = [1, 256], strides = [1, 1]} : vector<9x256xf32> to vector<1x256xf32>
    %69 = vector.broadcast %68 : vector<1x256xf32> to vector<32x256xf32>
    %70 = arith.mulf %67, %69 : vector<32x256xf32>
    %71 = vector.extract_strided_slice %14 {offsets = [0, 7], sizes = [32, 1], strides = [1, 1]} : vector<32x9xf32> to vector<32x1xf32>
    %72 = vector.broadcast %71 : vector<32x1xf32> to vector<32x256xf32>
    %73 = arith.mulf %70, %72 : vector<32x256xf32>
    %74 = arith.addf %66, %73 : vector<32x256xf32>
    %c239_i32 = arith.constant 239 : i32
    %75 = tpu.dynamic_rotate %13 by %c239_i32 dim 1 : vector<32x256xf32>, i32 -> vector<32x256xf32>
    %76 = vector.extract_strided_slice %15 {offsets = [8, 0], sizes = [1, 256], strides = [1, 1]} : vector<9x256xf32> to vector<1x256xf32>
    %77 = vector.broadcast %76 : vector<1x256xf32> to vector<32x256xf32>
    %78 = arith.mulf %75, %77 : vector<32x256xf32>
    %79 = vector.extract_strided_slice %14 {offsets = [0, 8], sizes = [32, 1], strides = [1, 1]} : vector<32x9xf32> to vector<32x1xf32>
    %80 = vector.broadcast %79 : vector<32x1xf32> to vector<32x256xf32>
    %81 = arith.mulf %78, %80 : vector<32x256xf32>
    %82 = arith.addf %74, %81 : vector<32x256xf32>
    %c0_12 = arith.constant 0 : index
    %c0_13 = arith.constant 0 : index
    %83 = vector.load %arg5[%c0_12, %c0_13] : memref<32x1xf32, #tpu.memory_space<vmem>>, vector<32x1xf32>
    %84 = vector.broadcast %83 : vector<32x1xf32> to vector<32x256xf32>
    %85 = arith.addf %82, %84 : vector<32x256xf32>
    %cst_14 = arith.constant 0.000000e+00 : f32
    %86 = vector.broadcast %cst_14 : f32 to vector<32x256xf32>
    %87 = arith.subf %86, %85 : vector<32x256xf32>
    %88 = math.exp %87 : vector<32x256xf32>
    %cst_15 = arith.constant 1.000000e+00 : f32
    %89 = vector.broadcast %cst_15 : f32 to vector<32x256xf32>
    %90 = arith.addf %89, %88 : vector<32x256xf32>
    %91 = tpu.reciprocal %90 {approx = true} : vector<32x256xf32> -> vector<32x256xf32>
    %92 = arith.mulf %85, %91 : vector<32x256xf32>
    %cst_16 = arith.constant dense<0.000000e+00> : vector<32xf32>
    %93 = vector.multi_reduction <add>, %92, %cst_16 [1] : vector<32x256xf32> to vector<32xf32>
    %94 = vector.shape_cast %93 : vector<32xf32> to vector<32x1xf32>
    %cst_17 = arith.constant 2.560000e+02 : f32
    %95 = vector.broadcast %cst_17 : f32 to vector<32x1xf32>
    %96 = arith.divf %94, %95 : vector<32x1xf32>
    %c0_18 = arith.constant 0 : index
    %c0_19 = arith.constant 0 : index
    %97 = vector.load %arg7[%c0_18, %c0_19] : memref<32x2xf32, #tpu.memory_space<vmem>>, vector<32x2xf32>
    %98 = vector.broadcast %96 : vector<32x1xf32> to vector<32x2xf32>
    %99 = arith.mulf %97, %98 : vector<32x2xf32>
    %cst_20 = arith.constant dense<0.000000e+00> : vector<2xf32>
    %100 = vector.multi_reduction <add>, %99, %cst_20 [0] : vector<32x2xf32> to vector<2xf32>
    %101 = vector.shape_cast %100 : vector<2xf32> to vector<1x2xf32>
    %c0_21 = arith.constant 0 : index
    %c0_22 = arith.constant 0 : index
    %102 = vector.load %arg8[%c0_21, %c0_22] : memref<1x2xf32, #tpu.memory_space<vmem>>, vector<1x2xf32>
    %103 = arith.addf %101, %102 : vector<1x2xf32>
    %cst_23 = arith.constant 0.000000e+00 : f32
    %104 = vector.broadcast %cst_23 : f32 to vector<1x2xf32>
    %105 = arith.subf %104, %103 : vector<1x2xf32>
    %106 = math.exp %105 : vector<1x2xf32>
    %cst_24 = arith.constant 1.000000e+00 : f32
    %107 = vector.broadcast %cst_24 : f32 to vector<1x2xf32>
    %108 = arith.addf %107, %106 : vector<1x2xf32>
    %109 = tpu.reciprocal %108 {approx = true} : vector<1x2xf32> -> vector<1x2xf32>
    %110 = arith.mulf %103, %109 : vector<1x2xf32>
    %c0_25 = arith.constant 0 : index
    %c0_26 = arith.constant 0 : index
    %111 = vector.load %arg9[%c0_25, %c0_26] : memref<32x2xf32, #tpu.memory_space<vmem>>, vector<32x2xf32>
    %112 = vector.broadcast %110 : vector<1x2xf32> to vector<32x2xf32>
    %113 = arith.mulf %111, %112 : vector<32x2xf32>
    %cst_27 = arith.constant dense<0.000000e+00> : vector<32xf32>
    %114 = vector.multi_reduction <add>, %113, %cst_27 [1] : vector<32x2xf32> to vector<32xf32>
    %115 = vector.shape_cast %114 : vector<32xf32> to vector<32x1xf32>
    %c0_28 = arith.constant 0 : index
    %c0_29 = arith.constant 0 : index
    %116 = vector.load %arg10[%c0_28, %c0_29] : memref<32x1xf32, #tpu.memory_space<vmem>>, vector<32x1xf32>
    %117 = arith.addf %115, %116 : vector<32x1xf32>
    %cst_30 = arith.constant 0.000000e+00 : f32
    %118 = vector.broadcast %cst_30 : f32 to vector<32x1xf32>
    %119 = arith.subf %118, %117 : vector<32x1xf32>
    %120 = math.exp %119 : vector<32x1xf32>
    %cst_31 = arith.constant 1.000000e+00 : f32
    %121 = vector.broadcast %cst_31 : f32 to vector<32x1xf32>
    %122 = arith.addf %121, %120 : vector<32x1xf32>
    %123 = tpu.reciprocal %122 {approx = true} : vector<32x1xf32> -> vector<32x1xf32>
    %124 = vector.broadcast %123 : vector<32x1xf32> to vector<32x256xf32>
    %125 = arith.mulf %92, %124 : vector<32x256xf32>
    %c0_32 = arith.constant 0 : index
    %c0_33 = arith.constant 0 : index
    %126 = vector.load %arg11[%c0_32, %c0_33] : memref<8x32xf32, #tpu.memory_space<vmem>>, vector<8x32xf32>
    %cst_34 = arith.constant dense<0.000000e+00> : vector<8x256xf32>
    %127 = tpu.matmul %126, %125, %cst_34 {dimension_numbers = #tpu.dot_dimension_numbers<[1], [0], [0], [1], [0, 0, 1, 1], [], []>} : vector<8x32xf32>, vector<32x256xf32>, vector<8x256xf32> -> vector<8x256xf32>
    %c0_35 = arith.constant 0 : index
    %c0_36 = arith.constant 0 : index
    %128 = vector.load %arg12[%c0_35, %c0_36] : memref<8x1xf32, #tpu.memory_space<vmem>>, vector<8x1xf32>
    %129 = vector.broadcast %128 : vector<8x1xf32> to vector<8x256xf32>
    %130 = arith.addf %127, %129 : vector<8x256xf32>
    %131 = arith.addf %130, %1 : vector<8x256xf32>
    %c0_37 = arith.constant 0 : index
    %c0_38 = arith.constant 0 : index
    %c0_39 = arith.constant 0 : index
    %132 = vector.load %arg13[%c0_37, %c0_38, %c0_39] : memref<1x8x256xf32, #tpu.memory_space<vmem>>, vector<1x8x256xf32>
    %133 = vector.shape_cast %132 : vector<1x8x256xf32> to vector<8x256xf32>
    %134 = vector.shape_cast %131 : vector<8x256xf32> to vector<1x8x256xf32>
    tpu.vector_store %arg13[%c0_37, %c0_38, %c0_39], %134 {strides = array<i32>} : memref<1x8x256xf32, #tpu.memory_space<vmem>>, vector<1x8x256xf32>,
    return
  }
  func.func @transform_0(%arg0: i32) -> (i32, i32, i32) {
    %c0_i32 = arith.constant 0 : i32
    %c0_i32_0 = arith.constant 0 : i32
    %c0_i32_1 = arith.constant 0 : i32
    return %arg0, %c0_i32, %c0_i32_0 : i32, i32, i32
  }
  func.func @transform_1(%arg0: i32) -> (i32, i32) {
    %c0_i32 = arith.constant 0 : i32
    %c0_i32_0 = arith.constant 0 : i32
    %c0_i32_1 = arith.constant 0 : i32
    return %c0_i32, %c0_i32_0 : i32, i32
  }
  func.func @transform_2(%arg0: i32) -> (i32, i32) {
    %c0_i32 = arith.constant 0 : i32
    %c0_i32_0 = arith.constant 0 : i32
    %c0_i32_1 = arith.constant 0 : i32
    return %c0_i32, %c0_i32_0 : i32, i32
  }
  func.func @transform_3(%arg0: i32) -> (i32, i32) {
    %c0_i32 = arith.constant 0 : i32
    %c0_i32_0 = arith.constant 0 : i32
    %c0_i32_1 = arith.constant 0 : i32
    return %c0_i32, %c0_i32_0 : i32, i32
  }
  func.func @transform_4(%arg0: i32) -> (i32, i32) {
    %c0_i32 = arith.constant 0 : i32
    %c0_i32_0 = arith.constant 0 : i32
    %c0_i32_1 = arith.constant 0 : i32
    return %c0_i32, %c0_i32_0 : i32, i32
  }
  func.func @transform_5(%arg0: i32) -> (i32, i32) {
    %c0_i32 = arith.constant 0 : i32
    %c0_i32_0 = arith.constant 0 : i32
    %c0_i32_1 = arith.constant 0 : i32
    return %c0_i32, %c0_i32_0 : i32, i32
  }
  func.func @transform_6(%arg0: i32) -> (i32, i32) {
    %c0_i32 = arith.constant 0 : i32
    %c0_i32_0 = arith.constant 0 : i32
    %c0_i32_1 = arith.constant 0 : i32
    return %c0_i32, %c0_i32_0 : i32, i32
  }
  func.func @transform_7(%arg0: i32) -> (i32, i32) {
    %c0_i32 = arith.constant 0 : i32
    %c0_i32_0 = arith.constant 0 : i32
    %c0_i32_1 = arith.constant 0 : i32
    return %c0_i32, %c0_i32_0 : i32, i32
  }
  func.func @transform_8(%arg0: i32) -> (i32, i32) {
    %c0_i32 = arith.constant 0 : i32
    %c0_i32_0 = arith.constant 0 : i32
    %c0_i32_1 = arith.constant 0 : i32
    return %c0_i32, %c0_i32_0 : i32, i32
  }
  func.func @transform_9(%arg0: i32) -> (i32, i32) {
    %c0_i32 = arith.constant 0 : i32
    %c0_i32_0 = arith.constant 0 : i32
    %c0_i32_1 = arith.constant 0 : i32
    return %c0_i32, %c0_i32_0 : i32, i32
  }
  func.func @transform_10(%arg0: i32) -> (i32, i32) {
    %c0_i32 = arith.constant 0 : i32
    %c0_i32_0 = arith.constant 0 : i32
    %c0_i32_1 = arith.constant 0 : i32
    return %c0_i32, %c0_i32_0 : i32, i32
  }
  func.func @transform_11(%arg0: i32) -> (i32, i32) {
    %c0_i32 = arith.constant 0 : i32
    %c0_i32_0 = arith.constant 0 : i32
    %c0_i32_1 = arith.constant 0 : i32
    return %c0_i32, %c0_i32_0 : i32, i32
  }
  func.func @transform_12(%arg0: i32) -> (i32, i32, i32) {
    %c0_i32 = arith.constant 0 : i32
    %c0_i32_0 = arith.constant 0 : i32
    %c0_i32_1 = arith.constant 0 : i32
    return %arg0, %c0_i32, %c0_i32_0 : i32, i32, i32
  }
}

</mosaic_0001>

<bundles_post_ra>
// kernel: tpu_custom_call.1
= control target key start
LH: loop header
LB: loop body
LE: loop exit
PB: predicated region body
PF: predicated region fallthrough
CT: control target
= control target key end

     0   :  { %s2716_s0 = inlined_call_operand.vmem [shape: f32[2,8,256], index: 0, kind: input, shape index: {}]   ;;  %s2717_s1 = inlined_call_operand.vmem [shape: f32[32,8], index: 1, kind: input, shape index: {}]   ;;  %s2718_s2 = inlined_call_operand.vmem [shape: f32[32,1], index: 2, kind: input, shape index: {}]   ;;  %s2719_s3 = inlined_call_operand.vmem [shape: f32[32,9], index: 3, kind: input, shape index: {}]   ;;  %s2720_s4 = inlined_call_operand.vmem [shape: f32[32,1], index: 4, kind: input, shape index: {}]   ;;  %s2721_s5 = inlined_call_operand.vmem [shape: f32[9,256], index: 5, kind: input, shape index: {}]   ;;  %s2722_s6 = inlined_call_operand.vmem [shape: f32[32,2], index: 6, kind: input, shape index: {}]   ;;  %s2723_s7 = inlined_call_operand.vmem [shape: f32[1,2], index: 7, kind: input, shape index: {}]   ;;  %s2724_s8 = inlined_call_operand.vmem [shape: f32[32,2], index: 8, kind: input, shape index: {}]   ;;  %s2725_s9 = inlined_call_operand.vmem [shape: f32[32,1], index: 9, kind: input, shape index: {}]   ;;  %s2726_s10 = inlined_call_operand.vmem [shape: f32[8,32], index: 10, kind: input, shape index: {}]   ;;  %s2727_s11 = inlined_call_operand.vmem [shape: f32[8,1], index: 11, kind: input, shape index: {}]   ;;  %s2728_s12 = inlined_call_operand.hbm [shape: f32[2,8,256], index: 12, kind: output, shape index: {}]  }
   0x1   :  { %2733 = sst [smem:[#allocation5_spill]] %s2716_s0 }
   0x2   :  { %2734 = sst [smem:[#allocation6_spill]] %s2717_s1 }
   0x3   :  { %2735 = sst [smem:[#allocation7_spill]] %s2718_s2 }
   0x4   :  { %17 = vsyncpa [#allocation3], 0 }
   0x5   :  { %19 = vsyncpa [#allocation3 + $0x1], 0  ;;  %s1827_s21 = smov 0   ;;  %s1829_s22 = smov 0  }
   0x6   :  { %s1831_s23 = smov 0   ;;  %s1833_s24 = smov 0  }
   0x7 LB: > { %s1848_s25 = sadd.s32 4294967295, %s1742_s24   ;;  %s1476_s26 = sadd.s32 4294967294, %s1742_s24   ;;  %s1742_s24 = sphi %s1833_s24, %s2746_s24   ;;  %s1738_s23 = sphi %s1831_s23, %s2745_s23   ;;  %s1734_s22 = sphi %s1829_s22, %s2744_s22   ;;  %s1730_s21 = sphi %s1827_s21, %s2743_s21  }
   0x8   : > { %s1852_s27 = sadd.s32 1, %s1742_s24   ;;  %s289_s28 = sadd.s32 1, %s1738_s23 }
   0x9   : > { %s286_s29 = ssub.s32 %s1742_s24, %s1852_s27  ;;  %p299_p0 = scmp.ne.s32.totalorder %s1738_s23, %s1734_s22 }
   0xa   : > { %p287_p1 = scmp.eq.s32.totalorder %s286_s29, 0  ;;  %p300_p2 = scmp.eq.s32.totalorder %s1848_s25, 1 }
   0xb   : > { %p305_p3 = scmp.ne.s32.totalorder %s1734_s22, %s1730_s21  ;;  %p306_p4 = scmp.eq.s32.totalorder %s1476_s26, 1 }
   0xc   : > { %s1863_s30 = scalar_select %p287_p1, %s1738_s23, %s289_s28  }
   0xd   : > { %p1865_p5 = por %p300_p2, %p299_p0  ;;  %p1869_p6 = por %p306_p4, %p305_p3 }
   0xe   : > { %p1479_p7 = scmp.ge.s32.totalorder %s1742_s24, 1  ;;  %p365_p8 = scmp.lt.s32.totalorder %s1742_s24, 3 }
  0x10   : > { %p366_p9 = pnand %p1479_p7, %p365_p8 }
  0x11   : > { %p407_p10 = scmp.lt.s32.totalorder (!%p366_p9), %s1848_s25, 1  ;;  %s2738_s2 = sld [smem:[#allocation7_spill]] (!%p366_p9) }
  0x12   : > { %369 = sbr.rel (%p366_p9) target bundleno = 1143 (0x477), region = 68  ;;  %s2739_s0 = sld [smem:[#allocation5_spill]] (!%p366_p9) }
  0x13   : > { %s2740_s1 = sld [smem:[#allocation6_spill]] (!%p366_p9)  ;;  %s1749_s20 = smov (!%p366_p9), 1  }
  0x14   : > { %s1750_s26 = smov (!%p366_p9), 17   ;;  %s1753_s29 = smov (!%p366_p9), 15  }
  0x15   : > { %s1754_s15 = smov (!%p366_p9), 113  }
  0x17   : > { %v1878_v0 = vld [vmem:[%s2719_s3 + $0x10] sm:$0xff]  ;;  %v1744_v1 = vmov 4   ;;  %s408_s19 = scalar_select %p407_p10, %s1848_s25, 1  ;;  %v2731_v3 = vmov 0   ;;  %v1890_v4 = vld [vmem:[%s2719_s3] sm:$0xff]  ;;  %vm442_vm0 = vcmask 64512  }
  0x18   : > { %1561 = vset.pattern.permute.xlu0 %v1744_v1  ;;  %v420_v2 = vld [vmem:[%s2738_s2 + $0x10] sm:$0xff]  ;;  %1560 = vset.pattern.permute.xlu2 %v1744_v1  ;;  %v421_v9 = vld [vmem:[%s2738_s2 + $0x18] sm:$0xff]  ;;  %v418_v10 = vld [vmem:[%s2738_s2] sm:$0xff]  ;;  %v1746_v16 = vmov 1   ;;  %v1747_v17 = vmov 2   ;;  %v1748_v18 = vmov 3  }
  0x19   : > { %581 = vperm.xlu0 %1561, %v1878_v0   ;;  %1559 = vset.pattern.permute.xlu1 %v2731_v3  ;;  %s1498_s28 = sshll.u32 %s408_s19, 4  ;;  %v414_v5 = vld [vmem:[%s2740_s1] sm:$0xff]  ;;  %v417_v8 = vld [vmem:[%s2740_s1 + $0x18] sm:$0xff]  ;;  %v1920_v11 = vld [vmem:[%s2719_s3 + $0x8] sm:$0xff]  ;;  %s1751_s19 = smov 127   ;;  %vm1246_vm10 = vcmask 15360  }
  0x1a   : > { %434 = vperm.xlu1 %1559, %v420_v2   ;;  %571 = vperm.xlu2 %1560, %v1890_v4   ;;  %s1896_s16 = scalar_lea.vmem %s2739_s0, %s1498_s28  ;;  %v415_v12 = vld [vmem:[%s2740_s1 + $0x8] sm:$0xff]  ;;  %v1933_v14 = vld [vmem:[%s2719_s3 + $0x18] sm:$0xff]  ;;  %v416_v15 = vld [vmem:[%s2740_s1 + $0x10] sm:$0xff]  ;;  %s1752_s28 = smov 16   ;;  %vm1352_vm11 = vcmask 261120  }
  0x1b   : > { %v412_v6 = vld [vmem:[%s1896_s16] sm:$0xff]  ;;  %v413_v7 = vld [vmem:[%s1896_s16 + $0x8] sm:$0xff] }
  0x1c   : > { %470 = vmatpush.msra.mxu0 %v412_v6  ;;  %1500 = vmatpush.msra.mxu2 %v412_v6  ;;  %v419_v13 = vld [vmem:[%s2738_s2 + $0x8] sm:$0xff] }
  0x1d   : > { %499 = vmatpush.msra.mxu1 %v413_v7  ;;  %1501 = vmatpush.msra.mxu3 %v413_v7 }
  0x1e   : > { %1483 = vmatmul.msk.f32.vlgmr.msra.gmra.mxu0 %vm442_vm0, %v414_v5  ;;  %1486 = vmatmul.msk.f32.vlgmr.msra.gmra.mxu2 %vm442_vm0, %v417_v8 }
  0x1f   : > { %1487 = vmatmul.msk.f32.vlgmr.msra.gmra.mxu1 %vm442_vm0, %v414_v5  ;;  %1490 = vmatmul.msk.f32.vlgmr.msra.gmra.mxu3 %vm442_vm0, %v417_v8 }
  0x21   : > { %1562 = vset.pattern.permute.xlu0 %v2731_v3 }
  0x22   : > { %439 = vperm.xlu1 %1559, %v421_v9   ;;  %424 = vperm.xlu0 %1562, %v418_v10  }
  0x23   : > { %576 = vperm.xlu2 %1560, %v1920_v11  }
  0x26   : > { %1484 = vmatmul.msk.f32.gmra.mxu0 %vm442_vm0, %v415_v12 }
  0x27   : > { %1488 = vmatmul.msk.f32.gmra.mxu1 %vm442_vm0, %v415_v12 }
  0x2a   : > { %1563 = vset.pattern.permute.xlu1 %v1744_v1  ;;  %429 = vperm.xlu0 %1562, %v419_v13  }
  0x2b   : > { %586 = vperm.xlu1 %1563, %v1933_v14   ;;  %1564 = vset.pattern.permute.xlu2 %v2731_v3 }
  0x2c   : > { %635 = vperm.xlu2 %1564, %v1890_v4  }
  0x2e   : > { %1485 = vmatmul.msk.f32.gmra.mxu0 %vm442_vm0, %v416_v15 }
  0x2f   : > { %1489 = vmatmul.msk.f32.gmra.mxu1 %vm442_vm0, %v416_v15 }
  0x32   : > { %639 = vperm.xlu0 %1562, %v1920_v11  }
  0x33   : > { %1565 = vset.pattern.permute.xlu1 %v2731_v3 }
  0x34   : > { %643 = vperm.xlu1 %1565, %v1878_v0   ;;  %647 = vperm.xlu2 %1564, %v1933_v14  }
  0x3a   : > { %1566 = vset.pattern.permute.xlu0 %v1746_v16 }
  0x3b   : > { %702 = vperm.xlu0 %1566, %v1890_v4  }
  0x3c   : > { %1567 = vset.pattern.permute.xlu1 %v1746_v16  ;;  %1568 = vset.pattern.permute.xlu2 %v1747_v17 }
  0x3d   : > { %706 = vperm.xlu1 %1567, %v1920_v11   ;;  %769 = vperm.xlu2 %1568, %v1890_v4  }
  0x43   : > { %1569 = vset.pattern.permute.xlu0 %v1747_v17 }
  0x44   : > { %773 = vperm.xlu0 %1569, %v1920_v11  }
  0x45   : > { %710 = vperm.xlu1 %1567, %v1878_v0   ;;  %777 = vperm.xlu2 %1568, %v1878_v0  }
  0x4c   : > { %1570 = vset.pattern.permute.xlu0 %v1748_v18 }
  0x4d   : > { %714 = vperm.xlu1 %1567, %v1933_v14   ;;  %836 = vperm.xlu0 %1570, %v1890_v4  }
  0x55   : > { %1571 = vset.pattern.permute.xlu1 %v1748_v18 }
  0x56   : > { %840 = vperm.xlu1 %1571, %v1920_v11  }
  0x8b   : > { %v1959_v19 = vpop.permute.xlu0 %581 }
  0x8c   : > { %v1961_v20 = vpop.permute.xlu1 %434 }
  0x94   : > { %v425_v21 = vpop.permute.xlu0 %424  ;;  %v440_v28 = vpop.permute.xlu1 %439 }
  0x9b   : > { %v472_v22 = vpop.f32.mrf.mxu0 }
  0x9c   : > { %v473_v23 = vadd.f32 %v472_v22, %v425_v21  ;;  %v501_v24 = vpop.f32.mrf.mxu1  ;;  %v430_v36 = vpop.permute.xlu0 %429 }
  0x9d   : > { %v502_v25 = vadd.f32 %v501_v24, %v425_v21 }
  0x9e   : > { %v513_v26 = vsub.f32 0.0, %v473_v23 }
  0x9f   : > { %v514_v27 = vsub.f32 0.0, %v502_v25 }
  0xa0   : > { %v521_v29 = vmul.f32 1.442695, %v513_v26 }
  0xa1   : > { %v523_v30 = vmul.f32 1.442695, %v514_v27  ;;  %v481_v31 = vpop.f32.mrf.mxu2 }
  0xa2   : > { %1591 = vpow2.f32 %v521_v29  ;;  %v482_v32 = vadd.f32 %v481_v31, %v440_v28  ;;  %v510_v44 = vpop.f32.mrf.mxu3 }
  0xa3   : > { %1593 = vpow2.f32 %v523_v30  ;;  %v475_v43 = vpop.f32.mrf.mxu0  ;;  %v511_v49 = vadd.f32 %v510_v44, %v440_v28  ;;  %v1755_v44 = vmov 5  }
  0xa4   : > { %v519_v33 = vsub.f32 0.0, %v482_v32  ;;  %v504_v34 = vpop.f32.mrf.mxu1  ;;  %v476_v46 = vadd.f32 %v475_v43, %v430_v36  ;;  %1572 = vset.pattern.permute.xlu1 %v1755_v44 }
  0xa5   : > { %v505_v38 = vadd.f32 %v504_v34, %v430_v36  ;;  %v520_v55 = vsub.f32 0.0, %v511_v49 }
  0xa6   : > { %v533_v35 = vmul.f32 1.442695, %v519_v33  ;;  %v515_v53 = vsub.f32 0.0, %v476_v46  ;;  %v2033_v33 = vpop.permute.xlu1 %586 }
  0xa7   : > { %v516_v42 = vsub.f32 0.0, %v505_v38  ;;  %v535_v57 = vmul.f32 1.442695, %v520_v55  ;;  %v2103_v55 = vld [vmem:[%s2721_s5] sm:$0xff] }
  0xa8   : > { %v1592_v37 = vpop.eup %1591  ;;  %1595 = vpow2.f32 %v533_v35  ;;  %v525_v56 = vmul.f32 1.442695, %v515_v53 }
  0xa9   : > { %v1594_v39 = vpop.eup %1593  ;;  %v537_v40 = vadd.f32 1.0, %v1592_v37  ;;  %v527_v47 = vmul.f32 1.442695, %v516_v42 }
  0xaa   : > { %v538_v41 = vadd.f32 1.0, %v1594_v39 }
  0xab   : > { %1597 = vrcp.f32 %v537_v40  ;;  %v478_v10 = vpop.f32.mrf.mxu0 }
  0xac   : > { %1599 = vrcp.f32 %v538_v41  ;;  %v507_v2 = vpop.f32.mrf.mxu1  ;;  %v479_v15 = vadd.f32 %v478_v10, %v1961_v20 }
  0xad   : > { %1601 = vpow2.f32 %v527_v47  ;;  %v508_v7 = vadd.f32 %v507_v2, %v1961_v20 }
  0xae   : > { %v1596_v45 = vpop.eup %1595  ;;  %v517_v22 = vsub.f32 0.0, %v479_v15  ;;  %v2045_v36 = vpop.permute.xlu1 %643 }
  0xaf   : > { %v543_v54 = vadd.f32 1.0, %v1596_v45  ;;  %v518_v9 = vsub.f32 0.0, %v508_v7 }
  0xb0   : > { %v529_v24 = vmul.f32 1.442695, %v517_v22 }
  0xb1   : > { %v1598_v48 = vpop.eup %1597  ;;  %1603 = vrcp.f32 %v543_v54  ;;  %v531_v16 = vmul.f32 1.442695, %v518_v9 }
  0xb2   : > { %v1600_v50 = vpop.eup %1599  ;;  %v1963_v51 = vmul.f32 %v1598_v48, %v473_v23  ;;  %1605 = vpow2.f32 %v525_v56  ;;  %v2001_v23 = vpop.permute.xlu2 %571  ;;  %v2108_v56 = vld [vmem:[%s2721_s5 + $0x8] sm:$0xff] }
  0xb3   : > { %v1965_v52 = vmul.f32 %v1600_v50, %v502_v25  ;;  %v1602_v58 = vpop.eup %1601  ;;  %1607 = vpow2.f32 %v535_v57  ;;  %v2116_v57 = vperm.slane %v2103_v55, 3 }
  0xb4   : > { %800 = vrot.lane.b32.xlu0 %v1963_v51, %s1749_s20  ;;  %597 = vrot.lane.b32.xlu2 %v1963_v51, %s1750_s26  ;;  %v540_v59 = vadd.f32 1.0, %v1602_v58  ;;  %v2119_v58 = vperm.slane %v2108_v56, 3  ;;  %v589_v22 = vmul.f32 %v2001_v23, %v1963_v51 }
  0xb5   : > { %605 = vrot.lane.b32.xlu1 %v1965_v52, %s1750_s26 }
  0xb6   : > { %1609 = vrcp.f32 %v540_v59  ;;  %v2057_v39 = vpop.permute.xlu1 %706  ;;  %v2125_v59 = vperm.slane %v2103_v55, 0 }
  0xb7   : > { %v1604_v60 = vpop.eup %1603 }
  0xb8   : > { %v1606_v61 = vpop.eup %1605  ;;  %v1979_v62 = vmul.f32 %v1604_v60, %v482_v32  ;;  %v2128_v60 = vperm.slane %v2108_v56, 0 }
  0xb9   : > { %v1608_v63 = vpop.eup %1607  ;;  %v539_v1 = vadd.f32 1.0, %v1606_v61 }
  0xba   : > { %v544_v5 = vadd.f32 1.0, %v1608_v63  ;;  %v2015_v26 = vpop.permute.xlu2 %576 }
  0xbb   : > { %1611 = vrcp.f32 %v539_v1 }
  0xbc   : > { %867 = vrot.lane.b32.xlu0 %v1963_v51, %s1751_s19  ;;  %674 = vrot.lane.b32.xlu2 %v1965_v52, %s1752_s28  ;;  %v1610_v6 = vpop.eup %1609  ;;  %1613 = vrcp.f32 %v544_v5 }
  0xbd   : > { %666 = vrot.lane.b32.xlu1 %v1963_v51, %s1752_s28  ;;  %v1988_v8 = vmul.f32 %v1610_v6, %v505_v38  ;;  %1615 = vpow2.f32 %v531_v16  ;;  %v2055_v38 = vpop.permute.xlu0 %639 }
  0xbe   : > { %1617 = vpow2.f32 %v529_v24  ;;  %v2069_v42 = vpop.permute.xlu1 %710  ;;  %v590_v24 = vmul.f32 %v2001_v23, %v1965_v52  ;;  %v2158_v23 = vperm.slane %v2108_v56, 1 }
  0xc1   : > { %v1612_v12 = vpop.eup %1611 }
  0xc2   : > { %v1614_v13 = vpop.eup %1613  ;;  %v1997_v17 = vmul.f32 %v1612_v12, %v476_v46  ;;  %v2023_v29 = vpop.permute.xlu2 %635 }
  0xc3   : > { %v1999_v21 = vmul.f32 %v1614_v13, %v511_v49  ;;  %v1616_v20 = vpop.eup %1615  ;;  %v613_v49 = vlaneseq }
  0xc4   : > { %603 = vrot.lane.b32.xlu0 %v1979_v62, %s1750_s26  ;;  %733 = vrot.lane.b32.xlu2 %v1963_v51, %s1753_s29  ;;  %v542_v25 = vadd.f32 1.0, %v1616_v20  ;;  %v1618_v27 = vpop.eup %1617 }
  0xc5   : > { %741 = vrot.lane.b32.xlu1 %v1965_v52, %s1753_s29  ;;  %v541_v28 = vadd.f32 1.0, %v1618_v27  ;;  %v2067_v41 = vpop.permute.xlu0 %702  ;;  %v2098_v54 = vand.u32 127, %v613_v49 }
  0xc6   : > { %1619 = vrcp.f32 %v542_v25  ;;  %v2083_v46 = vpop.permute.xlu1 %714 }
  0xc7   : > { %1621 = vrcp.f32 %v541_v28  ;;  %vm816_vm1 = vcmp.lt.s32.totalorder %v2098_v54, 1  ;;  %vm615_vm2 = vcmp.lt.s32.totalorder %v2098_v54, 17  ;;  %vm682_vm3 = vcmp.lt.s32.totalorder %v2098_v54, 16 }
  0xc8   : > { %vm883_vm4 = vcmp.lt.s32.totalorder %v2098_v54, 127  ;;  %vm749_vm5 = vcmp.lt.s32.totalorder %v2098_v54, 15  ;;  %vm950_vm6 = vcmp.lt.s32.totalorder %v2098_v54, 113  ;;  %vm1017_vm7 = vcmp.lt.s32.totalorder %v2098_v54, 112 }
  0xc9   : > { %vm1084_vm8 = vcmp.lt.s32.totalorder %v2098_v54, 111 }
  0xca   : > { %v2035_v34 = vpop.permute.xlu2 %647 }
  0xcc   : > { %676 = vrot.lane.b32.xlu0 %v1988_v8, %s1752_s28  ;;  %808 = vrot.lane.b32.xlu2 %v1965_v52, %s1749_s20  ;;  %v1620_v30 = vpop.eup %1619 }
  0xcd   : > { %934 = vrot.lane.b32.xlu1 %v1963_v51, %s1754_s15  ;;  %v2025_v31 = vmul.f32 %v1620_v30, %v508_v7  ;;  %v1622_v32 = vpop.eup %1621  ;;  %v2077_v45 = vpop.permute.xlu0 %773  ;;  %v2155_v30 = vperm.slane %v2103_v55, 1 }
  0xce   : > { %v2037_v35 = vmul.f32 %v1622_v32, %v479_v15  ;;  %v2094_v50 = vpop.permute.xlu1 %840 }
  0xd2   : > { %v2047_v37 = vpop.permute.xlu2 %769 }
  0xd4   : > { %735 = vrot.lane.b32.xlu0 %v1997_v17, %s1753_s29  ;;  %875 = vrot.lane.b32.xlu2 %v1965_v52, %s1751_s19 }
  0xd5   : > { %611 = vrot.lane.b32.xlu1 %v1999_v21, %s1750_s26  ;;  %v837_v48 = vpop.permute.xlu0 %836 }
  0xda   : > { %v2063_v40 = vpop.permute.xlu2 %777 }
  0xdc   : > { %810 = vrot.lane.b32.xlu0 %v1988_v8, %s1749_s20  ;;  %680 = vrot.lane.b32.xlu2 %v1999_v21, %s1752_s28 }
  0xdd   : > { %672 = vrot.lane.b32.xlu1 %v1979_v62, %s1752_s28 }
  0xe4   : > { %877 = vrot.lane.b32.xlu0 %v1988_v8, %s1751_s19  ;;  %747 = vrot.lane.b32.xlu2 %v1999_v21, %s1753_s29 }
  0xe5   : > { %739 = vrot.lane.b32.xlu1 %v1979_v62, %s1753_s29 }
  0xec   : > { %609 = vrot.lane.b32.xlu0 %v2025_v31, %s1750_s26  ;;  %806 = vrot.lane.b32.xlu2 %v1979_v62, %s1749_s20 }
  0xed   : > { %814 = vrot.lane.b32.xlu1 %v1999_v21, %s1749_s20 }
  0xf4   : > { %670 = vrot.lane.b32.xlu0 %v2037_v35, %s1752_s28  ;;  %607 = vrot.lane.b32.xlu2 %v1988_v8, %s1750_s26 }
  0xf5   : > { %599 = vrot.lane.b32.xlu1 %v1997_v17, %s1750_s26 }
  0xfc   : > { %879 = vrot.lane.b32.xlu0 %v2025_v31, %s1751_s19  ;;  %668 = vrot.lane.b32.xlu2 %v1997_v17, %s1752_s28 }
  0xfd   : > { %802 = vrot.lane.b32.xlu1 %v1997_v17, %s1749_s20 }
 0x104   : > { %942 = vrot.lane.b32.xlu0 %v1965_v52, %s1754_s15  ;;  %743 = vrot.lane.b32.xlu2 %v1988_v8, %s1753_s29 }
 0x105   : > { %869 = vrot.lane.b32.xlu1 %v1997_v17, %s1751_s19 }
 0x10c   : > { %844 = vperm.xlu0 %1570, %v1878_v0   ;;  %936 = vrot.lane.b32.xlu2 %v1997_v17, %s1754_s15 }
 0x10d   : > { %678 = vrot.lane.b32.xlu1 %v2025_v31, %s1752_s28 }
 0x10e   : > { %v598_v43 = vpop.permute.xlu2 %597 }
 0x114   : > { %873 = vrot.lane.b32.xlu0 %v1979_v62, %s1751_s19  ;;  %601 = vrot.lane.b32.xlu2 %v2037_v35, %s1750_s26  ;;  %s404_s26 = sand.u32 1, %s1734_s22  }
 0x115   : > { %737 = vrot.lane.b32.xlu1 %v2037_v35, %s1753_s29  ;;  %1575 = vset.pattern.permute.xlu0 %v1755_v44  ;;  %s1480_s28 = sshll.u32 %s404_s26, 4 }
 0x116   : > { %v675_v47 = vpop.permute.xlu2 %674  ;;  %s406_s17 = scalar_lea.vmem [#allocation2], %s1480_s28 }
 0x117   : > { %s1414_s18 = sshll.u32 %s406_s17, 4  ;;  %s1415_s18 = int_to_ptr.vmem [resolvable:$true] %s1414_s18 }
 0x11c   : > { %946 = vrot.lane.b32.xlu0 %v2025_v31, %s1754_s15  ;;  %745 = vrot.lane.b32.xlu2 %v2025_v31, %s1753_s29  ;;  %s1756_s29 = smov 112  }
 0x11d   : > { %804 = vrot.lane.b32.xlu1 %v2037_v35, %s1749_s20 }
 0x11e   : > { %v2096_v53 = vpop.permute.xlu2 %733 }
 0x124   : > { %1009 = vrot.lane.b32.xlu0 %v1965_v52, %s1756_s29  ;;  %812 = vrot.lane.b32.xlu2 %v2025_v31, %s1749_s20  ;;  %s1758_s20 = smov 111  }
 0x125   : > { %944 = vrot.lane.b32.xlu1 %v1988_v8, %s1754_s15 }
 0x126   : > { %v801_v61 = vpop.permute.xlu0 %800  ;;  %v809_v63 = vpop.permute.xlu2 %808 }
 0x127   : > { %v606_v1 = vpop.permute.xlu1 %605  ;;  %v817_v2 = vsel %vm816_vm1, %v801_v61, %v809_v63  ;;  %v821_v5 = vsel %vm816_vm1, %v809_v63, %v801_v61 }
 0x128   : > { %v616_v6 = vsel %vm615_vm2, %v598_v43, %v606_v1  ;;  %v620_v7 = vsel %vm615_vm2, %v606_v1, %v598_v43  ;;  %v827_v9 = vmul.f32 %v2116_v57, %v821_v5  ;;  %v828_v10 = vmul.f32 %v2119_v58, %v817_v2 }
 0x129   : > { %v626_v12 = vmul.f32 %v2125_v59, %v620_v7  ;;  %v627_v13 = vmul.f32 %v2128_v60, %v616_v6 }
 0x12a   : > { %v851_v15 = vmul.f32 %v837_v48, %v827_v9  ;;  %v852_v16 = vmul.f32 %v837_v48, %v828_v10  ;;  %v2186_v10 = vperm.slane %v2108_v56, 2 }
 0x12b   : > { %v650_v20 = vmul.f32 %v2023_v29, %v626_v12  ;;  %v651_v25 = vmul.f32 %v2023_v29, %v627_v13  ;;  %v1757_v13 = vmov 6  }
 0x12c   : > { %911 = vperm.xlu0 %1575, %v1878_v0   ;;  %871 = vrot.lane.b32.xlu2 %v2037_v35, %s1751_s19 }
 0x12d   : > { %v658_v27 = vadd.f32 %v650_v20, %v589_v22  ;;  %v659_v28 = vadd.f32 %v651_v25, %v590_v24  ;;  %903 = vperm.xlu1 %1572, %v1890_v4  }
 0x12e   : > { %v868_v29 = vpop.permute.xlu0 %867  ;;  %v876_v32 = vpop.permute.xlu2 %875 }
 0x12f   : > { %v667_v43 = vpop.permute.xlu1 %666  ;;  %v2162_v48 = vsel %vm883_vm4, %v868_v29, %v876_v32  ;;  %v2166_v49 = vsel %vm883_vm4, %v876_v32, %v868_v29 }
 0x130   : > { %v683_v61 = vsel %vm682_vm3, %v667_v43, %v675_v47  ;;  %v687_v63 = vsel %vm682_vm3, %v675_v47, %v667_v43  ;;  %v2183_v47 = vperm.slane %v2103_v55, 2 }
 0x131   : > { %v693_v1 = vmul.f32 %v2155_v30, %v687_v63  ;;  %v694_v2 = vmul.f32 %v2158_v23, %v683_v61 }
 0x133   : > { %v717_v5 = vmul.f32 %v2067_v41, %v693_v1  ;;  %v718_v6 = vmul.f32 %v2067_v41, %v694_v2 }
 0x134   : > { %1005 = vrot.lane.b32.xlu0 %v2037_v35, %s1756_s29  ;;  %781 = vperm.xlu2 %1568, %v1933_v14  }
 0x135   : > { %v725_v7 = vadd.f32 %v717_v5, %v658_v27  ;;  %v726_v9 = vadd.f32 %v718_v6, %v659_v28  ;;  %881 = vrot.lane.b32.xlu1 %v1999_v21, %s1751_s19 }
 0x136   : > { %v604_v12 = vpop.permute.xlu0 %603  ;;  %v681_v41 = vpop.permute.xlu2 %680  ;;  %1576 = vset.pattern.permute.xlu1 %v1757_v13 }
 0x137   : > { %v742_v22 = vpop.permute.xlu1 %741 }
 0x138   : > { %v750_v24 = vsel %vm749_vm5, %v2096_v53, %v742_v22  ;;  %v754_v20 = vsel %vm749_vm5, %v742_v22, %v2096_v53  ;;  %v596_v22 = vmul.f32 %v2033_v33, %v1999_v21 }
 0x139   : > { %v760_v25 = vmul.f32 %v2183_v47, %v754_v20  ;;  %v761_v27 = vmul.f32 %v2186_v10, %v750_v24  ;;  %v2729_v20 = vmov 7  }
 0x13b   : > { %v784_v28 = vmul.f32 %v2047_v37, %v760_v25  ;;  %v785_v29 = vmul.f32 %v2047_v37, %v761_v27 }
 0x13c   : > { %1070 = vrot.lane.b32.xlu0 %v1997_v17, %s1758_s20  ;;  %1573 = vset.pattern.permute.xlu2 %v1755_v44 }
 0x13d   : > { %v792_v32 = vadd.f32 %v784_v28, %v725_v7  ;;  %v793_v43 = vadd.f32 %v785_v29, %v726_v9  ;;  %1001 = vrot.lane.b32.xlu1 %v1963_v51, %s1756_s29  ;;  %907 = vperm.xlu2 %1573, %v1920_v11   ;;  %v595_v9 = vmul.f32 %v2033_v33, %v1979_v62 }
 0x13e   : > { %v677_v53 = vpop.permute.xlu0 %676  ;;  %v748_v61 = vpop.permute.xlu2 %747 }
 0x13f   : > { %v2205_v63 = vpop.permute.xlu1 %934  ;;  %v2207_v1 = vadd.f32 %v851_v15, %v792_v32  ;;  %v2209_v37 = vadd.f32 %v852_v16, %v793_v43 }
 0x144   : > { %915 = vperm.xlu0 %1575, %v1933_v14  }
 0x145   : > { %1011 = vrot.lane.b32.xlu1 %v1988_v8, %s1756_s29  ;;  %938 = vrot.lane.b32.xlu2 %v2037_v35, %s1754_s15 }
 0x146   : > { %v736_v44 = vpop.permute.xlu0 %735  ;;  %v807_v2 = vpop.permute.xlu2 %806  ;;  %1574 = vset.pattern.permute.xlu2 %v1748_v18 }
 0x147   : > { %v612_v5 = vpop.permute.xlu1 %611 }
 0x148   : > { %v619_v6 = vsel %vm615_vm2, %v604_v12, %v612_v5  ;;  %v623_v15 = vsel %vm615_vm2, %v612_v5, %v604_v12 }
 0x149   : > { %v632_v16 = vmul.f32 %v2125_v59, %v623_v15  ;;  %v633_v7 = vmul.f32 %v2128_v60, %v619_v6 }
 0x14b   : > { %v656_v24 = vmul.f32 %v2035_v34, %v632_v16  ;;  %v657_v18 = vmul.f32 %v2035_v34, %v633_v7 }
 0x14c   : > { %1579 = vset.pattern.permute.xlu0 %v2729_v20 }
 0x14d   : > { %v664_v25 = vadd.f32 %v656_v24, %v595_v9  ;;  %v665_v27 = vadd.f32 %v657_v18, %v596_v22  ;;  %970 = vperm.xlu1 %1576, %v1890_v4   ;;  %1041 = vperm.xlu0 %1579, %v1920_v11  }
 0x14e   : > { %1003 = vrot.lane.b32.xlu2 %v1997_v17, %s1756_s29  ;;  %v2234_v12 = vpop.permute.xlu0 %810  ;;  %v608_v28 = vpop.permute.xlu2 %607 }
 0x14f   : > { %v673_v33 = vpop.permute.xlu1 %672 }
 0x150   : > { %v686_v29 = vsel %vm682_vm3, %v673_v33, %v681_v41  ;;  %v690_v34 = vsel %vm682_vm3, %v681_v41, %v673_v33 }
 0x151   : > { %v699_v32 = vmul.f32 %v2155_v30, %v690_v34  ;;  %v700_v43 = vmul.f32 %v2158_v23, %v686_v29 }
 0x153   : > { %v723_v5 = vmul.f32 %v2083_v46, %v699_v32  ;;  %v724_v6 = vmul.f32 %v2083_v46, %v700_v43 }
 0x155   : > { %940 = vrot.lane.b32.xlu1 %v1979_v62, %s1754_s15  ;;  %1580 = vset.pattern.permute.xlu0 %v1757_v13  ;;  %v2247_v15 = vadd.f32 %v723_v5, %v664_v25  ;;  %v2253_v7 = vadd.f32 %v724_v6, %v665_v27 }
 0x156   : > { %848 = vperm.xlu2 %1574, %v1933_v14   ;;  %982 = vperm.xlu0 %1580, %v1933_v14   ;;  %v2251_v41 = vpop.permute.xlu0 %877  ;;  %v669_v16 = vpop.permute.xlu2 %668 }
 0x157   : > { %v740_v9 = vpop.permute.xlu1 %739  ;;  %v684_v46 = vsel %vm682_vm3, %v669_v16, %v677_v53  ;;  %v688_v22 = vsel %vm682_vm3, %v677_v53, %v669_v16 }
 0x158   : > { %v2261_v24 = vsel %vm749_vm5, %v740_v9, %v748_v61  ;;  %v2265_v18 = vsel %vm749_vm5, %v748_v61, %v740_v9 }
 0x15d   : > { %1013 = vrot.lane.b32.xlu1 %v2025_v31, %s1756_s29 }
 0x15e   : > { %1577 = vset.pattern.permute.xlu2 %v1757_v13  ;;  %1082 = vrot.lane.b32.xlu0 %v1999_v21, %s1758_s20  ;;  %v610_v25 = vpop.permute.xlu0 %609  ;;  %v744_v27 = vpop.permute.xlu2 %743 }
 0x15f   : > { %v815_v33 = vpop.permute.xlu1 %814  ;;  %974 = vperm.xlu2 %1577, %v1920_v11   ;;  %v751_v53 = vsel %vm749_vm5, %v736_v44, %v744_v27  ;;  %v755_v61 = vsel %vm749_vm5, %v744_v27, %v736_v44 }
 0x160   : > { %v2279_v29 = vsel %vm816_vm1, %v807_v2, %v815_v33  ;;  %v2283_v13 = vsel %vm816_vm1, %v815_v33, %v807_v2  ;;  %v695_v2 = vmul.f32 %v2155_v30, %v688_v22  ;;  %v762_v9 = vmul.f32 %v2183_v47, %v755_v61 }
 0x161   : > { %v763_v27 = vmul.f32 %v2186_v10, %v751_v53  ;;  %v591_v33 = vmul.f32 %v2015_v26, %v1997_v17 }
 0x162   : > { %v786_v17 = vmul.f32 %v2077_v45, %v762_v9 }
 0x165   : > { %1076 = vrot.lane.b32.xlu1 %v1965_v52, %s1758_s20  ;;  %v696_v52 = vmul.f32 %v2158_v23, %v684_v46  ;;  %v719_v46 = vmul.f32 %v2057_v39, %v695_v2 }
 0x166   : > { %v2287_v34 = vpop.permute.xlu0 %670  ;;  %v2289_v32 = vpop.permute.xlu2 %936 }
 0x167   : > { %v600_v43 = vpop.permute.xlu1 %599  ;;  %948 = vrot.lane.b32.xlu2 %v1999_v21, %s1754_s15  ;;  %v720_v61 = vmul.f32 %v2057_v39, %v696_v52 }
 0x168   : > { %v617_v44 = vsel %vm615_vm2, %v600_v43, %v608_v28  ;;  %v621_v5 = vsel %vm615_vm2, %v608_v28, %v600_v43  ;;  %1578 = vset.pattern.permute.xlu2 %v2729_v20  ;;  %v592_v28 = vmul.f32 %v2015_v26, %v1988_v8  ;;  %v1760_v20 = vmov 8  }
 0x169   : > { %v628_v6 = vmul.f32 %v2125_v59, %v621_v5  ;;  %v629_v16 = vmul.f32 %v2128_v60, %v617_v44  ;;  %1585 = vset.pattern.permute.xlu0 %v1760_v20  ;;  %v787_v26 = vmul.f32 %v2077_v45, %v763_v27 }
 0x16a   : > { %1116 = vperm.xlu0 %1585, %v1933_v14  }
 0x16b   : > { %v652_v43 = vmul.f32 %v2055_v38, %v628_v6  ;;  %v653_v22 = vmul.f32 %v2055_v38, %v629_v16 }
 0x16d   : > { %v660_v53 = vadd.f32 %v652_v43, %v591_v33  ;;  %v661_v44 = vadd.f32 %v653_v22, %v592_v28  ;;  %978 = vperm.xlu1 %1576, %v1878_v0   ;;  %v594_v22 = vmul.f32 %v1959_v19, %v2025_v31 }
 0x16e   : > { %v880_v5 = vpop.permute.xlu0 %879  ;;  %v602_v6 = vpop.permute.xlu2 %601 }
 0x16f   : > { %v727_v38 = vadd.f32 %v719_v46, %v660_v53  ;;  %v728_v16 = vadd.f32 %v720_v61, %v661_v44  ;;  %v803_v3 = vpop.permute.xlu1 %802  ;;  %1068 = vrot.lane.b32.xlu2 %v1963_v51, %s1758_s20  ;;  %v618_v2 = vsel %vm615_vm2, %v602_v6, %v610_v25  ;;  %v622_v39 = vsel %vm615_vm2, %v610_v25, %v602_v6 }
 0x170   : > { %v818_v52 = vsel %vm816_vm1, %v803_v3, %v2234_v12  ;;  %v822_v45 = vsel %vm816_vm1, %v2234_v12, %v803_v3  ;;  %v630_v9 = vmul.f32 %v2125_v59, %v622_v39  ;;  %v631_v27 = vmul.f32 %v2128_v60, %v618_v2 }
 0x171   : > { %v829_v51 = vmul.f32 %v2116_v57, %v822_v45  ;;  %v830_v33 = vmul.f32 %v2119_v58, %v818_v52  ;;  %v794_v28 = vadd.f32 %v786_v17, %v727_v38  ;;  %v795_v43 = vadd.f32 %v787_v26, %v728_v16 }
 0x172   : > { %v593_v25 = vmul.f32 %v1959_v19, %v2037_v35  ;;  %v654_v46 = vmul.f32 %v2045_v36, %v630_v9  ;;  %v655_v3 = vmul.f32 %v2045_v36, %v631_v27  ;;  %v2741_v53 = vmov 0  }
 0x173   : > { %v853_v59 = vmul.f32 %v2094_v50, %v829_v51  ;;  %v854_v60 = vmul.f32 %v2094_v50, %v830_v33  ;;  %1588 = vset.pattern.permute.xlu0 %v2741_v53  ;;  %v2742_v36 = vmov 7  }
 0x174   : > { %v662_v12 = vadd.f32 %v654_v46, %v593_v25  ;;  %v663_v61 = vadd.f32 %v655_v3, %v594_v22  ;;  %v766_v3 = vmul.f32 %v2183_v47, %v2265_v18 }
 0x175   : > { %1007 = vrot.lane.b32.xlu1 %v1979_v62, %s1756_s29  ;;  %v2345_v44 = vadd.f32 %v853_v59, %v794_v28  ;;  %v2347_v19 = vadd.f32 %v854_v60, %v795_v43 }
 0x176   : > { %v943_v17 = vpop.permute.xlu0 %942  ;;  %v746_v26 = vpop.permute.xlu2 %745  ;;  %1581 = vset.pattern.permute.xlu1 %v2742_v36 }
 0x177   : > { %v2353_v50 = vsel %vm950_vm6, %v2205_v63, %v943_v17  ;;  %v2358_v6 = vsel %vm950_vm6, %v943_v17, %v2205_v63  ;;  %v870_v38 = vpop.permute.xlu1 %869  ;;  %1078 = vrot.lane.b32.xlu2 %v1988_v8, %s1758_s20 }
 0x178   : > { %v885_v16 = vsel %vm883_vm4, %v870_v38, %v2251_v41  ;;  %v889_v2 = vsel %vm883_vm4, %v2251_v41, %v870_v38 }
 0x17d   : > { %1072 = vrot.lane.b32.xlu1 %v2037_v35, %s1758_s20 }
 0x17e   : > { %v845_v39 = vpop.permute.xlu0 %844  ;;  %v813_v52 = vpop.permute.xlu2 %812 }
 0x17f   : > { %v679_v45 = vpop.permute.xlu1 %678  ;;  %1037 = vperm.xlu2 %1578, %v1890_v4  }
 0x180   : > { %v685_v8 = vsel %vm682_vm3, %v2287_v34, %v679_v45  ;;  %v689_v63 = vsel %vm682_vm3, %v679_v45, %v2287_v34 }
 0x181   : > { %v697_v9 = vmul.f32 %v2155_v30, %v689_v63  ;;  %v698_v41 = vmul.f32 %v2158_v23, %v685_v8  ;;  %v893_v8 = vperm.slane %v2108_v56, 5 }
 0x183   : > { %v721_v27 = vmul.f32 %v2069_v42, %v697_v9  ;;  %v722_v35 = vmul.f32 %v2069_v42, %v698_v41 }
 0x185   : > { %v729_v51 = vadd.f32 %v721_v27, %v662_v12  ;;  %v730_v33 = vadd.f32 %v722_v35, %v663_v61  ;;  %1045 = vperm.xlu1 %1581, %v1878_v0   ;;  %v897_v27 = vmul.f32 %v893_v8, %v889_v2 }
 0x186   : > { %v2382_v28 = vpop.permute.xlu0 %873  ;;  %v872_v43 = vpop.permute.xlu2 %871 }
 0x187   : > { %v738_v25 = vpop.permute.xlu1 %737  ;;  %1015 = vrot.lane.b32.xlu2 %v1999_v21, %s1756_s29  ;;  %v886_v30 = vsel %vm883_vm4, %v872_v43, %v880_v5  ;;  %v890_v23 = vsel %vm883_vm4, %v880_v5, %v872_v43  ;;  %v767_v5 = vmul.f32 %v2186_v10, %v2261_v24  ;;  %s1499_s29 = sshll.u32 %s1848_s25, 4  ;;  %s1401_s25 = scalar_lea.sflag [#allocation3], %s404_s26 }
 0x188   : > { %v752_v42 = vsel %vm749_vm5, %v738_v25, %v746_v26  ;;  %v756_v34 = vsel %vm749_vm5, %v746_v26, %v738_v25  ;;  %1582 = vset.pattern.permute.xlu2 %v1760_v20  ;;  %v895_v25 = vmul.f32 %v893_v8, %v2166_v49  ;;  %s1412_s15 = scalar_lea.hbm %s2728_s12, %s1499_s29 }
 0x189   : > { %v764_v0 = vmul.f32 %v2183_v47, %v756_v34  ;;  %v765_v22 = vmul.f32 %v2186_v10, %v752_v42  ;;  %s1416_s0 = sshll.u32 %s1412_s15, 4  ;;  %s1700_s15 = scalar_lea.hbm %s2728_s12, 32  ;;  %s1417_s0 = int_to_ptr.hbm [resolvable:$true] %s1416_s0 }
 0x18b   : > { %v788_v21 = vmul.f32 %v2063_v40, %v764_v0  ;;  %v789_v46 = vmul.f32 %v2063_v40, %v765_v22 }
 0x18d   : > { %v796_v59 = vadd.f32 %v788_v21, %v729_v51  ;;  %v797_v60 = vadd.f32 %v789_v46, %v730_v33  ;;  %1583 = vset.pattern.permute.xlu1 %v1760_v20  ;;  %v899_v33 = vmul.f32 %v893_v8, %v890_v23  ;;  %v1137_v21 = vld [vmem:[%s2720_s4 + $0x10] sm:$0xff] }
 0x18e   : > { %1108 = vperm.xlu1 %1583, %v1920_v11   ;;  %v2405_v12 = vpop.permute.xlu0 %946  ;;  %v782_v61 = vpop.permute.xlu2 %781 }
 0x18f   : > { %v805_v17 = vpop.permute.xlu1 %804  ;;  %1080 = vrot.lane.b32.xlu2 %v2025_v31, %s1758_s20  ;;  %v790_v40 = vmul.f32 %v782_v61, %v766_v3  ;;  %v791_v26 = vmul.f32 %v782_v61, %v767_v5  ;;  %v892_v31 = vperm.slane %v2103_v55, 5  ;;  %v1677_v3 = vld [vmem:[%s2719_s3 + $0x10] sm:$0xff]  ;;  %v833_v61 = vmul.f32 %v2116_v57, %v2283_v13 }
 0x190   : > { %v819_v47 = vsel %vm816_vm1, %v805_v17, %v813_v52  ;;  %v823_v10 = vsel %vm816_vm1, %v813_v52, %v805_v17  ;;  %v834_v17 = vmul.f32 %v2119_v58, %v2279_v29  ;;  %v960_v13 = vperm.slane %v2108_v56, 6 }
 0x191   : > { %v831_v24 = vmul.f32 %v2116_v57, %v823_v10  ;;  %v832_v20 = vmul.f32 %v2119_v58, %v819_v47  ;;  %v798_v11 = vadd.f32 %v790_v40, %v2247_v15  ;;  %v799_v18 = vadd.f32 %v791_v26, %v2253_v7 }
 0x192   : > { %v896_v41 = vmul.f32 %v892_v31, %v885_v16  ;;  %v894_v43 = vmul.f32 %v892_v31, %v2162_v48  ;;  %v959_v57 = vperm.slane %v2103_v55, 6 }
 0x193   : > { %v855_v38 = vmul.f32 %v845_v39, %v831_v24  ;;  %v856_v45 = vmul.f32 %v845_v39, %v832_v20 }
 0x195   : > { %v863_v63 = vadd.f32 %v855_v38, %v796_v59  ;;  %v864_v9 = vadd.f32 %v856_v45, %v797_v60  ;;  %v1136_v59 = vld [vmem:[%s2720_s4 + $0x8] sm:$0xff]  ;;  %v1138_v45 = vld [vmem:[%s2720_s4 + $0x18] sm:$0xff] }
 0x196   : > { %1584 = vset.pattern.permute.xlu1 %v2742_v36  ;;  %v2420_v52 = vpop.permute.xlu0 %1009 }
 0x197   : > { %1049 = vperm.xlu1 %1584, %v1933_v14   ;;  %v945_v35 = vpop.permute.xlu1 %944  ;;  %1104 = vperm.xlu2 %1582, %v1890_v4   ;;  %v908_v15 = vpop.permute.xlu2 %907  ;;  %v898_v14 = vmul.f32 %v892_v31, %v886_v30  ;;  %v1135_v4 = vld [vmem:[%s2720_s4] sm:$0xff] }
 0x198   : > { %v952_v7 = vsel %vm950_vm6, %v2289_v32, %v945_v35  ;;  %v956_v39 = vsel %vm950_vm6, %v945_v35, %v2289_v32  ;;  %v920_v16 = vmul.f32 %v908_v15, %v896_v41  ;;  %v921_v2 = vmul.f32 %v908_v15, %v897_v27 }
 0x199   : > { %v964_v41 = vmul.f32 %v960_v13, %v956_v39 }
 0x19a   : > { %v2431_v36 = vadd.f32 %v920_v16, %v2345_v44  ;;  %v2434_v51 = vadd.f32 %v921_v2, %v2347_v19  ;;  %v2487_v16 = vperm.slane %v2103_v55, 7  ;;  %v2490_v2 = vperm.slane %v2108_v56, 7 }
 0x19e   : > { %v912_v42 = vpop.permute.xlu0 %911 }
 0x19f   : > { %v922_v32 = vmul.f32 %v912_v42, %v898_v14  ;;  %v923_v34 = vmul.f32 %v912_v42, %v899_v33  ;;  %1586 = vset.pattern.permute.xlu1 %v2741_v53  ;;  %v904_v44 = vpop.permute.xlu1 %903  ;;  %1074 = vrot.lane.b32.xlu2 %v1979_v62, %s1758_s20  ;;  %v2444_v19 = vpop.permute.xlu2 %938  ;;  %v961_v14 = vmul.f32 %v959_v57, %v2353_v50  ;;  %s1694_s20 = sshra.s32 %s1417_s0, 4  ;;  %s1695_s20 = int_to_ptr.hbm [resolvable:$true] %s1694_s20 }
 0x1a0   : > { %v918_v30 = vmul.f32 %v904_v44, %v894_v43  ;;  %v919_v23 = vmul.f32 %v904_v44, %v895_v25  ;;  %1141 = vperm.xlu1 %1586, %v1135_v4   ;;  %v962_v33 = vmul.f32 %v960_v13, %v2358_v6  ;;  %s1696_s29 = scalar_lea.hbm %s1695_s20, 16  ;;  %p1701_p0 = scmp.lt.s32.totalorder %s1695_s20, %s2728_s12 }
 0x1a1   : > { %v2446_v0 = vadd.f32 %v922_v32, %v863_v63  ;;  %v2448_v22 = vadd.f32 %v923_v34, %v864_v9  ;;  %v963_v9 = vmul.f32 %v959_v57, %v952_v7  ;;  %p1697_p11 = scmp.ne.s32.totalorder %s1695_s20, %s1696_s29  ;;  %p1702_p1 = scmp.lt.s32.totalorder %s1700_s15, %s1696_s29 }
 0x1a2   : > { %v926_v48 = vadd.f32 %v918_v30, %v2207_v1  ;;  %v927_v49 = vadd.f32 %v919_v23, %v2209_v37 }
 0x1a3   : > { %p1698_p12 = pnand %p1697_p11, %p1865_p5  ;;  %p1703_p2 = por %p1702_p1, %p1701_p0 }
 0x1a5   : > { %p1699_p13 = pneg %p1698_p12 }
 0x1a6   : > { %v2455_v46 = vpop.permute.xlu0 %1005 }
 0x1a7   : > { %v882_v62 = vpop.permute.xlu1 %881  ;;  %1112 = vperm.xlu2 %1582, %v1677_v3   ;;  %p1704_p3 = pnand %p1703_p2, %p1699_p13 }
 0x1a8   : > { %v887_v5 = vsel %vm883_vm4, %v2382_v28, %v882_v62  ;;  %v891_v1 = vsel %vm883_vm4, %v882_v62, %v2382_v28  ;;  %1151 = vperm.xlu1 %1586, %v1137_v21   ;;  %v1004_v37 = vpop.permute.xlu2 %1003 }
 0x1a9   : > { %v900_v20 = vmul.f32 %v892_v31, %v887_v5  ;;  %v901_v38 = vmul.f32 %v893_v8, %v891_v1 }
 0x1ae   : > { %v2469_v60 = vpop.permute.xlu0 %1070 }
 0x1af   : > { %v1002_v40 = vpop.permute.xlu1 %1001  ;;  %1587 = vset.pattern.permute.xlu2 %v2741_v53 }
 0x1b0   : > { %1146 = vperm.xlu2 %1587, %v1136_v59   ;;  %v849_v26 = vpop.permute.xlu2 %848 }
 0x1b1   : > { %v857_v28 = vmul.f32 %v849_v26, %v833_v61  ;;  %v858_v47 = vmul.f32 %v849_v26, %v834_v17  ;;  %v1018_v26 = vsel %vm1017_vm7, %v1002_v40, %v2420_v52 }
 0x1b3   : > { %v865_v10 = vadd.f32 %v857_v28, %v798_v11  ;;  %v866_v24 = vadd.f32 %v858_v47, %v799_v18  ;;  %v1022_v28 = vsel %vm1017_vm7, %v2420_v52, %v1002_v40 }
 0x1b6   : > { %v916_v58 = vpop.permute.xlu0 %915 }
 0x1b7   : > { %v924_v29 = vmul.f32 %v916_v58, %v900_v20  ;;  %v925_v53 = vmul.f32 %v916_v58, %v901_v38  ;;  %v1012_v63 = vpop.permute.xlu1 %1011  ;;  %v953_v58 = vsel %vm950_vm6, %v2444_v19, %v2405_v12 }
 0x1b8   : > { %v1019_v11 = vsel %vm1017_vm7, %v1004_v37, %v1012_v63  ;;  %v1023_v18 = vsel %vm1017_vm7, %v1012_v63, %v1004_v37  ;;  %1156 = vperm.xlu2 %1587, %v1138_v45   ;;  %v965_v40 = vmul.f32 %v959_v57, %v953_v58 }
 0x1b9   : > { %v932_v31 = vadd.f32 %v924_v29, %v865_v10  ;;  %v933_v8 = vadd.f32 %v925_v53, %v866_v24  ;;  %v975_v27 = vpop.permute.xlu2 %974  ;;  %v1030_v4 = vmul.f32 %v2487_v16, %v1019_v11  ;;  %v1031_v43 = vmul.f32 %v2490_v2, %v1023_v18 }
 0x1ba   : > { %v987_v35 = vmul.f32 %v975_v27, %v963_v9  ;;  %v988_v15 = vmul.f32 %v975_v27, %v964_v41  ;;  %v1028_v10 = vmul.f32 %v2487_v16, %v1018_v26  ;;  %v1029_v24 = vmul.f32 %v2490_v2, %v1022_v28 }
 0x1bb   : > { %v957_v29 = vsel %vm950_vm6, %v2405_v12, %v2444_v19 }
 0x1bc   : > { %v995_v7 = vadd.f32 %v987_v35, %v2431_v36  ;;  %v996_v39 = vadd.f32 %v988_v15, %v2434_v51  ;;  %v966_v63 = vmul.f32 %v960_v13, %v957_v29 }
 0x1bf   : > { %v971_v25 = vpop.permute.xlu1 %970  ;;  %v1042_v42 = vpop.permute.xlu0 %1041 }
 0x1c0   : > { %v985_v32 = vmul.f32 %v971_v25, %v961_v14  ;;  %v986_v55 = vmul.f32 %v971_v25, %v962_v33  ;;  %v1054_v34 = vmul.f32 %v1042_v42, %v1030_v4  ;;  %v1055_v44 = vmul.f32 %v1042_v42, %v1031_v43 }
 0x1c1   : > { %v949_v56 = vpop.permute.xlu2 %948 }
 0x1c2   : > { %v993_v30 = vadd.f32 %v985_v32, %v926_v48  ;;  %v994_v23 = vadd.f32 %v986_v55, %v927_v49  ;;  %v2498_v36 = vadd.f32 %v1054_v34, %v995_v7  ;;  %v2500_v51 = vadd.f32 %v1055_v44, %v996_v39 }
 0x1c7   : > { %v941_v50 = vpop.permute.xlu1 %940 }
 0x1c8   : > { %v954_v6 = vsel %vm950_vm6, %v941_v50, %v949_v56  ;;  %v958_v21 = vsel %vm950_vm6, %v949_v56, %v941_v50  ;;  %v983_v62 = vpop.permute.xlu0 %982 }
 0x1c9   : > { %v967_v3 = vmul.f32 %v959_v57, %v954_v6  ;;  %v968_v5 = vmul.f32 %v960_v13, %v958_v21  ;;  %v1069_v1 = vpop.permute.xlu2 %1068  ;;  %v1589_v57 = vld [vmem:[%s2721_s5 + $0x10] ss:$0 sm:$0xff] }
 0x1cb   : > { %v991_v37 = vmul.f32 %v983_v62, %v967_v3  ;;  %v992_v59 = vmul.f32 %v983_v62, %v968_v5 }
 0x1cd   : > { %v2506_v61 = vadd.f32 %v991_v37, %v932_v31  ;;  %v2508_v48 = vadd.f32 %v992_v59, %v933_v8 }
 0x1cf   : > { %v2510_v49 = vpop.permute.xlu1 %1013 }
 0x1d0   : > { %v1024_v29 = vsel %vm1017_vm7, %v2510_v49, %v2455_v46 }
 0x1d1   : > { %v1079_v17 = vpop.permute.xlu2 %1078 }
 0x1d2   : > { %v1086_v42 = vsel %vm1084_vm8, %v2469_v60, %v1079_v17  ;;  %v1090_v32 = vsel %vm1084_vm8, %v1079_v17, %v2469_v60 }
 0x1d3   : > { %v1097_v44 = vmul.f32 %v1589_v57, %v1086_v42 }
 0x1d7   : > { %v1077_v47 = vpop.permute.xlu1 %1076 }
 0x1d8   : > { %v1085_v12 = vsel %vm1084_vm8, %v1069_v1, %v1077_v47  ;;  %v1089_v19 = vsel %vm1084_vm8, %v1077_v47, %v1069_v1 }
 0x1d9   : > { %v1038_v20 = vpop.permute.xlu2 %1037  ;;  %v1095_v13 = vmul.f32 %v1589_v57, %v1085_v12 }
 0x1da   : > { %v1052_v38 = vmul.f32 %v1038_v20, %v1028_v10  ;;  %v1053_v45 = vmul.f32 %v1038_v20, %v1029_v24 }
 0x1dc   : > { %v1060_v53 = vadd.f32 %v1052_v38, %v993_v30  ;;  %v1061_v52 = vadd.f32 %v1053_v45, %v994_v23  ;;  %v1083_v30 = vpop.permute.xlu0 %1082  ;;  %v1020_v45 = vsel %vm1017_vm7, %v2455_v46, %v2510_v49 }
 0x1df   : > { %v979_v9 = vpop.permute.xlu1 %978 }
 0x1e0   : > { %v989_v41 = vmul.f32 %v979_v9, %v965_v40  ;;  %v990_v11 = vmul.f32 %v979_v9, %v966_v63 }
 0x1e1   : > { %v1016_v18 = vpop.permute.xlu2 %1015 }
 0x1e2   : > { %v2529_v31 = vadd.f32 %v989_v41, %v2446_v0  ;;  %v2532_v8 = vadd.f32 %v990_v11, %v2448_v22  ;;  %v1590_v0 = vld [vmem:[%s2721_s5 + $0x18] ss:$0 sm:$0xff]  ;;  %v1032_v41 = vmul.f32 %v2487_v16, %v1020_v45 }
 0x1e3   : > { %v1096_v15 = vmul.f32 %v1590_v0, %v1089_v19  ;;  %v1098_v56 = vmul.f32 %v1590_v0, %v1090_v32 }
 0x1e4   : > { %v1117_v38 = vpop.permute.xlu0 %1116 }
 0x1e7   : > { %v1008_v27 = vpop.permute.xlu1 %1007 }
 0x1e8   : > { %v1021_v23 = vsel %vm1017_vm7, %v1008_v27, %v1016_v18  ;;  %v1025_v50 = vsel %vm1017_vm7, %v1016_v18, %v1008_v27  ;;  %v1033_v18 = vmul.f32 %v2490_v2, %v1024_v29 }
 0x1e9   : > { %v1081_v35 = vpop.permute.xlu2 %1080  ;;  %v1034_v62 = vmul.f32 %v2487_v16, %v1021_v23  ;;  %v1035_v3 = vmul.f32 %v2490_v2, %v1025_v50 }
 0x1ef   : > { %v1073_v22 = vpop.permute.xlu1 %1072 }
 0x1f0   : > { %v1091_v40 = vsel %vm1084_vm8, %v1081_v35, %v1073_v22 }
 0x1f1   : > { %v1105_v7 = vpop.permute.xlu2 %1104  ;;  %v1100_v46 = vmul.f32 %v1590_v0, %v1091_v40 }
 0x1f2   : > { %v1119_v39 = vmul.f32 %v1105_v7, %v1095_v13  ;;  %v1120_v14 = vmul.f32 %v1105_v7, %v1096_v15 }
 0x1f4   : > { %v1127_v33 = vadd.f32 %v1119_v39, %v1060_v53  ;;  %v1128_v4 = vadd.f32 %v1120_v14, %v1061_v52  ;;  %v1087_v53 = vsel %vm1084_vm8, %v1073_v22, %v1081_v35 }
 0x1f5   : > { %v1099_v27 = vmul.f32 %v1589_v57, %v1087_v53 }
 0x1f7   : > { %v1046_v43 = vpop.permute.xlu1 %1045 }
 0x1f8   : > { %v1056_v49 = vmul.f32 %v1046_v43, %v1032_v41  ;;  %v1057_v15 = vmul.f32 %v1046_v43, %v1033_v18 }
 0x1f9   : > { %v1075_v25 = vpop.permute.xlu2 %1074 }
 0x1fa   : > { %v1088_v60 = vsel %vm1084_vm8, %v1075_v25, %v1083_v30  ;;  %v1092_v5 = vsel %vm1084_vm8, %v1083_v30, %v1075_v25  ;;  %v1064_v25 = vadd.f32 %v1056_v49, %v2529_v31 }
 0x1fb   : > { %v1101_v47 = vmul.f32 %v1589_v57, %v1088_v60  ;;  %v1102_v20 = vmul.f32 %v1590_v0, %v1092_v5  ;;  %v1065_v0 = vadd.f32 %v1057_v15, %v2532_v8 }
 0x1fd   : > { %v1125_v63 = vmul.f32 %v1117_v38, %v1101_v47  ;;  %v1126_v11 = vmul.f32 %v1117_v38, %v1102_v20 }
 0x200   : > { %v1109_v55 = vpop.permute.xlu1 %1108 }
 0x201   : > { %v1113_v34 = vpop.permute.xlu2 %1112  ;;  %v1121_v6 = vmul.f32 %v1109_v55, %v1097_v44  ;;  %v1122_v21 = vmul.f32 %v1109_v55, %v1098_v56 }
 0x202   : > { %v1123_v16 = vmul.f32 %v1113_v34, %v1099_v27  ;;  %v1124_v39 = vmul.f32 %v1113_v34, %v1100_v46 }
 0x203   : > { %v1129_v37 = vadd.f32 %v1121_v6, %v2498_v36  ;;  %v1130_v59 = vadd.f32 %v1122_v21, %v2500_v51 }
 0x204   : > { %v1131_v56 = vadd.f32 %v1123_v16, %v1064_v25  ;;  %v1132_v30 = vadd.f32 %v1124_v39, %v1065_v0 }
 0x209   : > { %v1050_v1 = vpop.permute.xlu1 %1049 }
 0x20a   : > { %v1058_v17 = vmul.f32 %v1050_v1, %v1034_v62  ;;  %v1059_v26 = vmul.f32 %v1050_v1, %v1035_v3  ;;  %v1147_v28 = vpop.permute.xlu2 %1146 }
 0x20b   : > { %v2563_v10 = vadd.f32 %v1147_v28, %v1129_v37  ;;  %v2565_v24 = vadd.f32 %v1147_v28, %v1130_v59 }
 0x20c   : > { %v1066_v58 = vadd.f32 %v1058_v17, %v2506_v61  ;;  %v1067_v52 = vadd.f32 %v1059_v26, %v2508_v48 }
 0x20d   : > { %v1169_v36 = vsub.f32 0.0, %v2563_v10  ;;  %v1170_v51 = vsub.f32 0.0, %v2565_v24 }
 0x20e   : > { %v1133_v12 = vadd.f32 %v1125_v63, %v1066_v58  ;;  %v1134_v13 = vadd.f32 %v1126_v11, %v1067_v52 }
 0x20f   : > { %v1179_v9 = vmul.f32 1.442695, %v1169_v36  ;;  %v1181_v61 = vmul.f32 1.442695, %v1170_v51 }
 0x211   : > { %1623 = vpow2.f32 %v1179_v9 }
 0x212   : > { %1625 = vpow2.f32 %v1181_v61  ;;  %v1142_v19 = vpop.permute.xlu1 %1141  ;;  %v1157_v48 = vpop.permute.xlu2 %1156 }
 0x213   : > { %v1159_v54 = vadd.f32 %v1142_v19, %v1127_v33  ;;  %v1160_v35 = vadd.f32 %v1142_v19, %v1128_v4  ;;  %v2585_v22 = vadd.f32 %v1157_v48, %v1133_v12  ;;  %v2587_v7 = vadd.f32 %v1157_v48, %v1134_v13 }
 0x214   : > { %v1761_v13 = vmov 256.0  }
 0x215   : > { %v1167_v14 = vsub.f32 0.0, %v1159_v54  ;;  %v1168_v2 = vsub.f32 0.0, %v1160_v35  ;;  %v1173_v32 = vsub.f32 0.0, %v2585_v22  ;;  %v1174_v4 = vsub.f32 0.0, %v2587_v7 }
 0x217   : > { %v1624_v57 = vpop.eup %1623  ;;  %v1175_v42 = vmul.f32 1.442695, %v1167_v14  ;;  %v1177_v33 = vmul.f32 1.442695, %v1168_v2  ;;  %v1187_v23 = vmul.f32 1.442695, %v1173_v32 }
 0x218   : > { %v1626_v55 = vpop.eup %1625  ;;  %v1193_v43 = vadd.f32 1.0, %v1624_v57  ;;  %v1189_v8 = vmul.f32 1.442695, %v1174_v4  ;;  %v1240_v32 = vld [vmem:[%s2722_s6 + $0x10] sm:$0xff] }
 0x219   : > { %v1194_v44 = vadd.f32 1.0, %v1626_v55  ;;  %1627 = vpow2.f32 %v1175_v42  ;;  %v1239_v42 = vld [vmem:[%s2722_s6 + $0x8] sm:$0xff] }
 0x21a   : > { %1629 = vrcp.f32 %v1193_v43  ;;  %v1152_v34 = vpop.permute.xlu1 %1151 }
 0x21b   : > { %1631 = vrcp.f32 %v1194_v44  ;;  %v1163_v50 = vadd.f32 %v1152_v34, %v1131_v56  ;;  %v1164_v31 = vadd.f32 %v1152_v34, %v1132_v30  ;;  %v1241_v44 = vld [vmem:[%s2722_s6 + $0x18] sm:$0xff] }
 0x21c   : > { %1633 = vpow2.f32 %v1177_v33 }
 0x21d   : > { %v1171_v6 = vsub.f32 0.0, %v1163_v50  ;;  %v1172_v21 = vsub.f32 0.0, %v1164_v31  ;;  %1635 = vpow2.f32 %v1187_v23 }
 0x21e   : > { %1637 = vpow2.f32 %v1189_v8 }
 0x21f   : > { %v1628_v62 = vpop.eup %1627  ;;  %v1183_v3 = vmul.f32 1.442695, %v1171_v6  ;;  %v1185_v60 = vmul.f32 1.442695, %v1172_v21 }
 0x220   : > { %v1630_v5 = vpop.eup %1629  ;;  %v1191_v1 = vadd.f32 1.0, %v1628_v62 }
 0x221   : > { %v1632_v37 = vpop.eup %1631  ;;  %1639 = vpow2.f32 %v1183_v3  ;;  %v2594_v59 = vmul.f32 %v1630_v5, %v2563_v10 }
 0x222   : > { %v1634_v17 = vpop.eup %1633  ;;  %1641 = vrcp.f32 %v1191_v1  ;;  %v2597_v26 = vmul.f32 %v1632_v37, %v2565_v24  ;;  %v1260_v37 = vld [vmem:[%s2723_s7] sm:$0x1] }
 0x223   : > { %v1192_v28 = vadd.f32 1.0, %v1634_v17  ;;  %1643 = vpow2.f32 %v1185_v60  ;;  %v1636_v20 = vpop.eup %1635 }
 0x224   : > { %v1218_v47 = vadd.f32 %v2597_v26, %v2594_v59  ;;  %v1638_v38 = vpop.eup %1637  ;;  %v1197_v24 = vadd.f32 1.0, %v1636_v20 }
 0x225   : > { %1645 = vrcp.f32 %v1192_v28  ;;  %v1198_v52 = vadd.f32 1.0, %v1638_v38 }
 0x226   : > { %1219 = vadd.xlane.f32.xlu1 %v1218_v47 }
 0x227   : > { %v1640_v45 = vpop.eup %1639 }
 0x228   : > { %v1642_v58 = vpop.eup %1641  ;;  %v1195_v36 = vadd.f32 1.0, %v1640_v45 }
 0x229   : > { %v1644_v51 = vpop.eup %1643  ;;  %v2601_v29 = vmul.f32 %v1642_v58, %v1159_v54 }
 0x22a   : > { %v1196_v10 = vadd.f32 1.0, %v1644_v51  ;;  %1647 = vrcp.f32 %v1195_v36  ;;  %v1271_v51 = vld [vmem:[%s2724_s8 + $0x18] sm:$0xff] }
 0x22b   : > { %v1646_v53 = vpop.eup %1645 }
 0x22c   : > { %1649 = vrcp.f32 %v1196_v10  ;;  %v2603_v40 = vmul.f32 %v1646_v53, %v1160_v35  ;;  %v1270_v10 = vld [vmem:[%s2724_s8 + $0x10] sm:$0xff]  ;;  %v1269_v53 = vld [vmem:[%s2724_s8 + $0x8] sm:$0xff] }
 0x22d   : > { %1651 = vrcp.f32 %v1197_v24 }
 0x22e   : > { %v1215_v63 = vadd.f32 %v2603_v40, %v2601_v29  ;;  %1653 = vrcp.f32 %v1198_v52 }
 0x22f   : > { %1655 = vrcp.f32 %v1761_v13 }
 0x230   : > { %v1648_v9 = vpop.eup %1647  ;;  %1216 = vadd.xlane.f32.xlu0 %v1215_v63 }
 0x231   : > { %v2607_v61 = vmul.f32 %v1648_v9, %v1163_v50 }
 0x232   : > { %v1650_v41 = vpop.eup %1649 }
 0x233   : > { %v2609_v11 = vmul.f32 %v1650_v41, %v1164_v31  ;;  %v1652_v18 = vpop.eup %1651 }
 0x234   : > { %v1654_v12 = vpop.eup %1653  ;;  %v2614_v46 = vmul.f32 %v1652_v18, %v2585_v22 }
 0x235   : > { %v1221_v27 = vadd.f32 %v2609_v11, %v2607_v61  ;;  %v2617_v49 = vmul.f32 %v1654_v12, %v2587_v7  ;;  %v1656_v48 = vpop.eup %1655  ;;  %v1238_v7 = vld [vmem:[%s2722_s6] sm:$0xff] }
 0x236   : > { %v1228_v15 = vmul.f32 256.0, %v1656_v48  ;;  %vm1232_vm9 = vweird.f32 %v1656_v48  ;;  %v1268_v12 = vld [vmem:[%s2724_s8] sm:$0xff] }
 0x237   : > { %1222 = vadd.xlane.f32.xlu2 %v1221_v27  ;;  %v1224_v19 = vadd.f32 %v2617_v49, %v2614_v46 }
 0x238   : > { %v1229_v54 = vsub.f32 1.0, %v1228_v15  ;;  %v1291_v15 = vld [vmem:[%s2725_s9 + $0x10] sm:$0xff] }
 0x23a   : > { %v1230_v35 = vmul.f32 %v1656_v48, %v1229_v54  ;;  %v1290_v54 = vld [vmem:[%s2725_s9 + $0x8] sm:$0xff] }
 0x23c   : > { %v1231_v16 = vadd.f32 %v1656_v48, %v1230_v35 }
 0x23e   : > { %v1233_v14 = vsel %vm1232_vm9, %v1656_v48, %v1231_v16  ;;  %v1292_v48 = vld [vmem:[%s2725_s9 + $0x18] sm:$0xff] }
 0x23f   : > { %1225 = vadd.xlane.f32.xlu2 %v1224_v19 }
 0x299   : > { %v1220_v2 = vpop.xlane.xlu1 %1219 }
 0x29a   : > { %v1235_v25 = vmul.f32 %v1233_v14, %v1220_v2 }
 0x29c   : > { %v1243_v43 = vmul.f32 %v1239_v42, %v1235_v25 }
 0x29e   : > { %v1248_v30 = vsel %vm1246_vm10, %v1243_v43, 0.0 }
 0x2a3   : > { %v1217_v39 = vpop.xlane.xlu0 %1216 }
 0x2a4   : > { %v1234_v22 = vmul.f32 %v1233_v14, %v1217_v39 }
 0x2a6   : > { %v1242_v55 = vmul.f32 %v1238_v7, %v1234_v22 }
 0x2a8   : > { %v1247_v4 = vsel %vm1246_vm10, %v1242_v55, 0.0  ;;  %v1289_v55 = vld [vmem:[%s2725_s9] sm:$0xff] }
 0x2a9   : > { %v1249_v50 = vadd.f32 %v1248_v30, %v1247_v4 }
 0x2aa   : > { %v1223_v57 = vpop.xlane.xlu2 %1222 }
 0x2ab   : > { %v1236_v0 = vmul.f32 %v1233_v14, %v1223_v57 }
 0x2ad   : > { %v1244_v33 = vmul.f32 %v1240_v32, %v1236_v0 }
 0x2af   : > { %v1250_v34 = vsel %vm1246_vm10, %v1244_v33, 0.0 }
 0x2b0   : > { %v1251_v8 = vadd.f32 %v1250_v34, %v1249_v50 }
 0x2b2   : > { %v1226_v56 = vpop.xlane.xlu2 %1225 }
 0x2b3   : > { %v1237_v23 = vmul.f32 %v1233_v14, %v1226_v56 }
 0x2b5   : > { %v1245_v31 = vmul.f32 %v1241_v44, %v1237_v23 }
 0x2b7   : > { %v1252_v6 = vsel %vm1246_vm10, %v1245_v31, 0.0 }
 0x2b8   : > { %v1253_v21 = vadd.f32 %v1252_v6, %v1251_v8 }
 0x2ba   : > { %v1254_v62 = vrot.slane %v1253_v21, 4 }
 0x2bc   : > { %v1255_v3 = vadd.f32 %v1254_v62, %v1253_v21 }
 0x2be   : > { %v1256_v60 = vrot.slane %v1255_v3, 2 }
 0x2c0   : > { %v1257_v5 = vadd.f32 %v1256_v60, %v1255_v3  ;;  %v1346_v60 = vld [vmem:[%s2727_s11] sm:$0xff] }
 0x2c2   : > { %v1258_v1 = vrot.slane %v1257_v5, 1 }
 0x2c4   : > { %v1259_v17 = vadd.f32 %v1258_v1, %v1257_v5 }
 0x2c6   : > { %v1261_v28 = vadd.f32 %v1260_v37, %v1259_v17 }
 0x2c8   : > { %v1262_v47 = vsub.f32 0.0, %v1261_v28 }
 0x2ca   : > { %v1263_v20 = vmul.f32 1.442695, %v1262_v47 }
 0x2cc   : > { %1657 = vpow2.f32 %v1263_v20 }
 0x2d2   : > { %v1658_v38 = vpop.eup %1657 }
 0x2d3   : > { %v1265_v45 = vadd.f32 1.0, %v1658_v38 }
 0x2d5   : > { %1659 = vrcp.f32 %v1265_v45 }
 0x2db   : > { %v1660_v58 = vpop.eup %1659 }
 0x2dc   : > { %v1267_v36 = vmul.f32 %v1660_v58, %v1261_v28 }
 0x2de   : > { %v1272_v24 = vperm.slane %v1267_v36, 0 }
 0x2e0   : > { %v1276_v52 = vmul.f32 %v1272_v24, %v1271_v51  ;;  %v1275_v63 = vmul.f32 %v1272_v24, %v1270_v10  ;;  %v1274_v9 = vmul.f32 %v1272_v24, %v1269_v53  ;;  %v1273_v19 = vmul.f32 %v1272_v24, %v1268_v12  ;;  %v1678_v51 = vld [vmem:[%s1896_s16] sm:$0xff]  ;;  %v1679_v53 = vld [vmem:[%s1896_s16 + $0x8] sm:$0xff] }
 0x2e2   : > { %v1286_v41 = vsel %vm1246_vm10, %v1276_v52, 0.0  ;;  %v1283_v18 = vsel %vm1246_vm10, %v1275_v63, 0.0  ;;  %v1280_v27 = vsel %vm1246_vm10, %v1274_v9, 0.0  ;;  %v1277_v13 = vsel %vm1246_vm10, %v1273_v19, 0.0 }
 0x2e3   : > { %1287 = vadd.xlane.f32.xlu0 %v1286_v41  ;;  %1284 = vadd.xlane.f32.xlu1 %v1283_v18 }
 0x2e4   : > { %1281 = vadd.xlane.f32.xlu2 %v1280_v27 }
 0x2eb   : > { %1278 = vadd.xlane.f32.xlu0 %v1277_v13 }
 0x356   : > { %v1288_v35 = vpop.xlane.xlu0 %1287  ;;  %v1285_v16 = vpop.xlane.xlu1 %1284 }
 0x357   : > { %v1296_v39 = vadd.f32 %v1292_v48, %v1288_v35  ;;  %v1295_v14 = vadd.f32 %v1291_v15, %v1285_v16  ;;  %v1282_v2 = vpop.xlane.xlu2 %1281 }
 0x358   : > { %v1294_v22 = vadd.f32 %v1290_v54, %v1282_v2 }
 0x359   : > { %v1300_v7 = vsub.f32 0.0, %v1296_v39  ;;  %v1299_v57 = vsub.f32 0.0, %v1295_v14 }
 0x35a   : > { %v1298_v25 = vsub.f32 0.0, %v1294_v22 }
 0x35b   : > { %v1307_v0 = vmul.f32 1.442695, %v1300_v7  ;;  %v1305_v42 = vmul.f32 1.442695, %v1299_v57 }
 0x35c   : > { %v1303_v32 = vmul.f32 1.442695, %v1298_v25 }
 0x35d   : > { %1661 = vpow2.f32 %v1307_v0 }
 0x35e   : > { %1663 = vpow2.f32 %v1305_v42  ;;  %v1279_v43 = vpop.xlane.xlu0 %1278 }
 0x35f   : > { %1665 = vpow2.f32 %v1303_v32  ;;  %v1293_v33 = vadd.f32 %v1289_v55, %v1279_v43 }
 0x361   : > { %v1297_v4 = vsub.f32 0.0, %v1293_v33 }
 0x363   : > { %v1662_v44 = vpop.eup %1661  ;;  %v1301_v56 = vmul.f32 1.442695, %v1297_v4 }
 0x364   : > { %v1664_v30 = vpop.eup %1663  ;;  %v1312_v34 = vadd.f32 1.0, %v1662_v44 }
 0x365   : > { %v1666_v23 = vpop.eup %1665  ;;  %v1311_v50 = vadd.f32 1.0, %v1664_v30  ;;  %1667 = vpow2.f32 %v1301_v56 }
 0x366   : > { %1669 = vrcp.f32 %v1312_v34  ;;  %v1310_v31 = vadd.f32 1.0, %v1666_v23 }
 0x367   : > { %1671 = vrcp.f32 %v1311_v50 }
 0x368   : > { %1673 = vrcp.f32 %v1310_v31 }
 0x36b   : > { %v1668_v8 = vpop.eup %1667 }
 0x36c   : > { %v1670_v6 = vpop.eup %1669  ;;  %v1309_v21 = vadd.f32 1.0, %v1668_v8 }
 0x36d   : > { %v1672_v62 = vpop.eup %1671  ;;  %1334 = vperm.xlu1 %1586, %v1670_v6  }
 0x36e   : > { %v1674_v3 = vpop.eup %1673  ;;  %1675 = vrcp.f32 %v1309_v21  ;;  %1329 = vperm.xlu2 %1587, %v1672_v62  }
 0x36f   : > { %1324 = vperm.xlu0 %1588, %v1674_v3  }
 0x374   : > { %v1676_v5 = vpop.eup %1675 }
 0x375   : > { %1319 = vperm.xlu1 %1586, %v1676_v5  }
 0x376   : > { %1349 = vperm.xlu2 %1587, %v1346_v60  }
 0x3c8   : > { %v1330_v1 = vpop.permute.xlu2 %1329 }
 0x3c9   : > { %v1341_v20 = vmul.f32 %v1330_v1, %v2607_v61  ;;  %v1342_v38 = vmul.f32 %v1330_v1, %v2609_v11  ;;  %v1345_v61 = vld [vmem:[%s2726_s10] sm:$0xff] }
 0x3df   : > { %v1335_v37 = vpop.permute.xlu1 %1334 }
 0x3e0   : > { %v1343_v17 = vmul.f32 %v1335_v37, %v2614_v46  ;;  %v1344_v28 = vmul.f32 %v1335_v37, %v2617_v49 }
 0x3e1   : > { %v1325_v47 = vpop.permute.xlu0 %1324 }
 0x3e2   : > { %1368 = vmatpush.msrb.mxu2 %v1343_v17  ;;  %1388 = vmatpush.msrb.mxu3 %v1344_v28  ;;  %v1339_v45 = vmul.f32 %v1325_v47, %v2594_v59  ;;  %v1340_v58 = vmul.f32 %v1325_v47, %v2597_v26  ;;  %v1350_v59 = vpop.permute.xlu2 %1349 }
 0x3e4   : > { %1369 = vmatpush.msrb.mxu2 %v1341_v20  ;;  %1389 = vmatpush.msrb.mxu3 %v1342_v38 }
 0x3e6   : > { %1370 = vmatpush.msrb.mxu2 %v1339_v45  ;;  %1390 = vmatpush.msrb.mxu3 %v1340_v58 }
 0x3e7   : > { %v1320_v46 = vpop.permute.xlu1 %1319 }
 0x3e8   : > { %v1337_v49 = vmul.f32 %v1320_v46, %v2601_v29  ;;  %v1338_v36 = vmul.f32 %v1320_v46, %v2603_v40 }
 0x3ea   : > { %1371 = vmatpush.msrb.mxu2 %v1337_v49  ;;  %1391 = vmatpush.msrb.mxu3 %v1338_v36 }
 0x3eb   : > { %1491 = vmatmul.msk.f32.vlgmr.msrb.gmra.mxu2 %vm1352_vm11, %v1345_v61  ;;  %1492 = vmatmul.msk.f32.vlgmr.msrb.gmra.mxu3 %vm1352_vm11, %v1345_v61 }
 0x46e   : > { %v1373_v26 = vpop.f32.mrf.mxu2  ;;  %v1393_v29 = vpop.f32.mrf.mxu3 }
 0x46f   : > { %v1374_v40 = vadd.f32 %v1373_v26, %v1350_v59  ;;  %v1394_v11 = vadd.f32 %v1393_v29, %v1350_v59 }
 0x471   : > { %v1396_v10 = vadd.f32 %v1678_v51, %v1374_v40  ;;  %v1397_v24 = vadd.f32 %v1679_v53, %v1394_v11 }
 0x473   : > { %1398 = vst [vmem:[%s406_s17] sm:$0xff] %v1396_v10 }
 0x474   : > { %1399 = vst [vmem:[%s406_s17 + $0x8] sm:$0xff] %v1397_v24 }
 0x475   : > { %1707 = shalt.err (!%p1704_p3)
}
 0x476   : > { %1502 = dma.vmem_to_hbm [thread:$0]  (%p1865_p5), %s1415_s18, 256, %s1417_s0, %s1401_s25  }
 0x477 PF: > { %p1508_p4 = scmp.ge.s32.totalorder %s1742_s24, 2  ;;  %s1428_s16 = sand.u32 1, %s1730_s21  }
 0x478   : > { %s1429_s26 = scalar_lea.sflag [#allocation3], %s1428_s16 }
 0x479   : > { %p1505_p7 = pnand %p1508_p4, %p1869_p6 }
 0x47b   : > { %p1506_p8 = pneg %p1505_p7 }
 0x47d   : > { %1725 = dma.done.wait (%p1506_p8), %s1429_s26, 256  }
 0x47e   : > { %1727 = vsyncadd (%p1506_p8), %s1429_s26, 4294967040  ;;  %p22_p9 = scmp.ge.s32.totalorder %s1852_s27, 4   ;;  %s2743_s21 = smov %s1734_s22 }
 0x47f   : > { %s2744_s22 = smov %s1738_s23  ;;  %s2745_s23 = smov %s1863_s30 }
 0x480   : > { %s2746_s24 = smov %s1852_s27  ;;  %24 = sbr.rel (!%p22_p9) target bundleno = 7 (0x7), region = 103 }
 0x485   :  { %1435 = vsyncpa [#allocation3], 1 }
 0x486   :  { %1437 = vsyncpa [#allocation3 + $0x1], 1 }

</bundles_post_ra>
